<compile_context>
chip_gen: v7x
topology: tpu7x:2x2x1
jax: 0.10.0
libtpu: 0.0.40
codegen_flags: <defaults>
</compile_context>

<pallas_src>
import jax
import jax.numpy as jnp
from jax import lax
from jax.experimental import pallas as pl
from jax.experimental.pallas import tpu as pltpu

INPUT_DIM = 5
HIDDEN_DIM = 32
NUM_LAYERS = 2     # hard-wired: the kernel unrolls the two layers per timestep
OUTPUT_DIM = 1

CHUNK_T = 16       # timesteps per grid step (time axis streamed / double-buffered)
SUBLANE = 8        # batch padded to a multiple of 8 sublanes


def _lstm_recurrent_kernel(gates1_ref, wcomb_ref, b2_ref, h2out_ref,
                           state_ref, rec1_ref):
    """Recurrent core of the 2-layer LSTM.

    gates1_ref : (CHUNK_T, Bp, 4H)   precomputed x_t @ W_ih1^T + (b_ih1 + b_hh1)
    wcomb_ref  : (2H, 8H)            fused weight: [h1_t, h2_{t-1}] @ wcomb =
                                     [ layer-2 gate pre-acts (4H) |
                                       layer-1 recurrent term for t+1 (4H) ]
    b2_ref     : (1, 4H)             layer-2 bias (b_ih2 + b_hh2)
    h2out_ref  : (1, Bp, CHUNK_T*H)  layer-2 hidden states, time packed along lanes
    state_ref  : (3, Bp, H)          VMEM scratch: c1, c2, h2 carried across chunks
    rec1_ref   : (Bp, 4H)            VMEM scratch: h1 @ W_hh1^T carried across chunks
    """
    H = HIDDEN_DIM
    Bp = state_ref.shape[1]

    @pl.when(pl.program_id(0) == 0)
    def _():
        state_ref[...] = jnp.zeros_like(state_ref)   # c0 = h0 = 0
        rec1_ref[...] = jnp.zeros_like(rec1_ref)     # h1_{-1} @ W_hh1^T = 0

    # Loop-invariant loads: weights and the bias broadcast are hoisted out of the loop.
    wcomb = wcomb_ref[...]                                   # (2H, 8H)
    b2 = jnp.broadcast_to(b2_ref[...], (Bp, 4 * H))          # hoisted broadcast

    c1 = state_ref[0]
    c2 = state_ref[1]
    h2 = state_ref[2]
    rec1 = rec1_ref[...]

    outs = []
    for t in range(CHUNK_T):                                 # statically unrolled
        # ---- layer 1: recurrent term came from the previous step's fused matmul ----
        g1 = gates1_ref[t] + rec1                            # (Bp, 4H)
        sig1 = jax.nn.sigmoid(g1)                            # one 128-lane EUP pass
        tnh1 = jnp.tanh(g1)                                  # one 128-lane EUP pass
        c1 = sig1[:, H:2 * H] * c1 + sig1[:, 0:H] * tnh1[:, 2 * H:3 * H]
        h1 = sig1[:, 3 * H:4 * H] * jnp.tanh(c1)

        # ---- single fused MXU matmul per timestep ----
        hcat = jnp.concatenate([h1, h2], axis=1)             # (Bp, 2H)
        m = jnp.dot(hcat, wcomb, preferred_element_type=jnp.float32)  # (Bp, 8H)
        g2 = m[:, 0:4 * H] + b2                              # layer-2 gates (step t)
        rec1 = m[:, 4 * H:8 * H]                             # layer-1 recurrent (t+1)

        sig2 = jax.nn.sigmoid(g2)
        tnh2 = jnp.tanh(g2)
        c2 = sig2[:, H:2 * H] * c2 + sig2[:, 0:H] * tnh2[:, 2 * H:3 * H]
        h2 = sig2[:, 3 * H:4 * H] * jnp.tanh(c2)
        outs.append(h2)

    # One lane-dense store for the whole chunk: (Bp, CHUNK_T*H) with 128-aligned lanes.
    h2out_ref[...] = jnp.concatenate(outs, axis=-1)[None].astype(h2out_ref.dtype)

    # persist state for the next time chunk
    state_ref[0] = c1
    state_ref[1] = c2
    state_ref[2] = h2
    rec1_ref[...] = rec1


def lstm_forward(x, params):
    """x: (B, T, INPUT_DIM) float32 -> (B, T, OUTPUT_DIM) float32."""
    B, T, D = x.shape
    assert D == INPUT_DIM
    H = HIDDEN_DIM

    Bp = ((B + SUBLANE - 1) // SUBLANE) * SUBLANE
    Tp = ((T + CHUNK_T - 1) // CHUNK_T) * CHUNK_T
    n_chunks = Tp // CHUNK_T

    x_tm = jnp.transpose(x, (1, 0, 2))                                   # (T, B, D)
    x_tm = jnp.pad(x_tm, ((0, Tp - T), (0, Bp - B), (0, 0)))             # (Tp, Bp, D)

    # Hoisted layer-1 input projection (+ folded bias): one big lane-dense matmul.
    gates1 = jnp.einsum("tbd,dg->tbg", x_tm, params["wih1_t"]) + params["b1"]  # (Tp,Bp,4H)

    # Fused per-step weight: [h1_t, h2_{t-1}] @ wcomb
    #   cols 0:4H  -> layer-2 gate pre-activations at step t
    #   cols 4H:8H -> layer-1 recurrent pre-activations for step t+1 (h1_t @ W_hh1^T)
    wcomb = jnp.concatenate(
        [jnp.concatenate([params["wih2_t"], params["whh1_t"]], axis=1),       # rows 0:H
         jnp.concatenate([params["whh2_t"],
                          jnp.zeros_like(params["whh1_t"])], axis=1)],        # rows H:2H
        axis=0)                                                               # (2H, 8H)

    h2_seq = pl.pallas_call(
        _lstm_recurrent_kernel,
        out_shape=jax.ShapeDtypeStruct((n_chunks, Bp, CHUNK_T * H), jnp.float32),
        grid_spec=pltpu.PrefetchScalarGridSpec(
            num_scalar_prefetch=0,
            grid=(n_chunks,),
            in_specs=[
                pl.BlockSpec((CHUNK_T, Bp, 4 * H), lambda t: (t, 0, 0)),  # streamed gates
                pl.BlockSpec((2 * H, 8 * H), lambda t: (0, 0)),           # fused weight
                pl.BlockSpec((1, 4 * H), lambda t: (0, 0)),               # b2
            ],
            out_specs=pl.BlockSpec((1, Bp, CHUNK_T * H), lambda t: (t, 0, 0)),
            scratch_shapes=[pltpu.VMEM((3, Bp, H), jnp.float32),          # c1, c2, h2
                            pltpu.VMEM((Bp, 4 * H), jnp.float32)],        # rec1
        ),
        compiler_params=pltpu.CompilerParams(
            dimension_semantics=("arbitrary",)),   # sequential time dependence
    )(gates1, wcomb, params["b2"])

    # Unpack lane-packed time axis: (nc, Bp, CHUNK_T*H) -> (Tp, Bp, H), then crop padding.
    h2_seq = h2_seq.reshape(n_chunks, Bp, CHUNK_T, H)
    h2_seq = jnp.transpose(h2_seq, (0, 2, 1, 3)).reshape(Tp, Bp, H)
    h2_seq = h2_seq[:T, :B]

    # fc head hoisted out of the recurrence (OUTPUT_DIM=1 would be a 1-lane store in-kernel).
    y = jnp.einsum("tbh,ho->tbo", h2_seq, params["wfc_t"]) + params["bfc"]
    return jnp.transpose(y, (1, 0, 2))                                    # (B, T, OUTPUT_DIM)


def init_params(key):
    """Deterministic init mimicking nn.LSTM/nn.Linear shapes (uniform(-k, k), k=1/sqrt(H))."""
    k = 1.0 / jnp.sqrt(jnp.float32(HIDDEN_DIM))
    ks = jax.random.split(key, 10)

    def u(kk, shape):
        return jax.random.uniform(kk, shape, jnp.float32, minval=-k, maxval=k)

    # layer 0
    wih1 = u(ks[0], (4 * HIDDEN_DIM, INPUT_DIM))
    whh1 = u(ks[1], (4 * HIDDEN_DIM, HIDDEN_DIM))
    bih1 = u(ks[2], (4 * HIDDEN_DIM,))
    bhh1 = u(ks[3], (4 * HIDDEN_DIM,))
    # layer 1
    wih2 = u(ks[4], (4 * HIDDEN_DIM, HIDDEN_DIM))
    whh2 = u(ks[5], (4 * HIDDEN_DIM, HIDDEN_DIM))
    bih2 = u(ks[6], (4 * HIDDEN_DIM,))
    bhh2 = u(ks[7], (4 * HIDDEN_DIM,))
    # fc
    wfc = u(ks[8], (OUTPUT_DIM, HIDDEN_DIM))
    bfc = u(ks[9], (OUTPUT_DIM,))

    return {
        "wih1_t": wih1.T, "whh1_t": whh1.T, "b1": (bih1 + bhh1).reshape(1, -1),
        "wih2_t": wih2.T, "whh2_t": whh2.T, "b2": (bih2 + bhh2).reshape(1, -1),
        "wfc_t": wfc.T, "bfc": bfc.reshape(1, -1),
    }


def lstm_reference(x, params):
    """Pure-JAX reference (same math, f32) used to validate the kernel."""
    B, T, _ = x.shape
    H = HIDDEN_DIM

    def cell(xt, h, c, wih_t, whh_t, b):
        g = xt @ wih_t + h @ whh_t + b
        i = jax.nn.sigmoid(g[:, 0 * H:1 * H])
        f = jax.nn.sigmoid(g[:, 1 * H:2 * H])
        gg = jnp.tanh(g[:, 2 * H:3 * H])
        o = jax.nn.sigmoid(g[:, 3 * H:4 * H])
        c = f * c + i * gg
        h = o * jnp.tanh(c)
        return h, c

    def step(carry, xt):
        h1, c1, h2, c2 = carry
        h1, c1 = cell(xt, h1, c1, params["wih1_t"], params["whh1_t"], params["b1"])
        h2, c2 = cell(h1, h2, c2, params["wih2_t"], params["whh2_t"], params["b2"])
        y = h2 @ params["wfc_t"] + params["bfc"]
        return (h1, c1, h2, c2), y

    z = jnp.zeros((B, H), jnp.float32)
    _, ys = lax.scan(step, (z, z, z, z), jnp.transpose(x, (1, 0, 2)))
    return jnp.transpose(ys, (1, 0, 2))


if __name__ == "__main__":
    key = jax.random.PRNGKey(0)
    kx, kp = jax.random.split(key)

    B, T = 2, 8
    x = jax.random.normal(kx, (B, T, INPUT_DIM), jnp.float32)
    params = init_params(kp)

    fwd = jax.jit(lstm_forward)
    out = jax.block_until_ready(fwd(x, params))

    ref = lstm_reference(x, params)
    assert out.shape == (B, T, OUTPUT_DIM)
    assert jnp.allclose(out, ref, atol=1e-4, rtol=1e-4)

    # TODO(synk): optional bf16 MXU inputs (v6e) and v7x 2-TC batch split skipped —
    # kept f32 and a single core to preserve exact forward-pass semantics at B=2.
    print("KERNEL_OK")
</pallas_src>

<mosaic_0001>
module attributes {stable_mosaic.version = 11 : i64} {
  func.func @_lstm_recurrent_kernel(%arg0: i32, %arg1: memref<16x8x128xf32, #tpu.memory_space<vmem>>, %arg2: memref<64x256xf32, #tpu.memory_space<vmem>>, %arg3: memref<1x128xf32, #tpu.memory_space<vmem>>, %arg4: memref<1x8x512xf32, #tpu.memory_space<vmem>>, %arg5: memref<3x8x32xf32, #tpu.memory_space<vmem>>, %arg6: memref<8x128xf32, #tpu.memory_space<vmem>>) attributes {dimension_semantics = [#tpu.dimension_semantics<arbitrary>], iteration_bounds = array<i64: 1>, scalar_prefetch = 0 : i64, scratch_operands = 2 : i64, tpu.core_type = #tpu.core_type<tc>, window_params = [{transform_indices = @transform_0, window_bounds = array<i64: 16, 8, 128>}, {pipeline_mode = #tpu.pipeline_mode<synchronous>, transform_indices = @transform_1, window_bounds = array<i64: 64, 256>}, {pipeline_mode = #tpu.pipeline_mode<synchronous>, transform_indices = @transform_2, window_bounds = array<i64: 1, 128>}, {transform_indices = @transform_3, window_bounds = array<i64: 1, 8, 512>}]} {
    %c0_i32 = arith.constant 0 : i32
    %0 = arith.cmpi eq, %arg0, %c0_i32 : i32
    %1 = arith.extui %0 : i1 to i32
    %c0_i32_0 = arith.constant 0 : i32
    %2 = arith.cmpi ne, %1, %c0_i32_0 : i32
    scf.if %2 {
      %cst_109 = arith.constant 0.000000e+00 : f32
      %635 = vector.broadcast %cst_109 : f32 to vector<3x8x32xf32>
      %c0_110 = arith.constant 0 : index
      %c0_111 = arith.constant 0 : index
      %c0_112 = arith.constant 0 : index
      %636 = vector.load %arg5[%c0_110, %c0_111, %c0_112] : memref<3x8x32xf32, #tpu.memory_space<vmem>>, vector<3x8x32xf32>
      tpu.vector_store %arg5[%c0_110, %c0_111, %c0_112], %635 {strides = array<i32>} : memref<3x8x32xf32, #tpu.memory_space<vmem>>, vector<3x8x32xf32>,
      %cst_113 = arith.constant 0.000000e+00 : f32
      %637 = vector.broadcast %cst_113 : f32 to vector<8x128xf32>
      %c0_114 = arith.constant 0 : index
      %c0_115 = arith.constant 0 : index
      %638 = vector.load %arg6[%c0_114, %c0_115] : memref<8x128xf32, #tpu.memory_space<vmem>>, vector<8x128xf32>
      tpu.vector_store %arg6[%c0_114, %c0_115], %637 {strides = array<i32>} : memref<8x128xf32, #tpu.memory_space<vmem>>, vector<8x128xf32>,
    } else {
    }
    %c0 = arith.constant 0 : index
    %c0_1 = arith.constant 0 : index
    %3 = vector.load %arg2[%c0, %c0_1] : memref<64x256xf32, #tpu.memory_space<vmem>>, vector<64x256xf32>
    %c0_2 = arith.constant 0 : index
    %c0_3 = arith.constant 0 : index
    %4 = vector.load %arg3[%c0_2, %c0_3] : memref<1x128xf32, #tpu.memory_space<vmem>>, vector<1x128xf32>
    %5 = vector.shape_cast %4 : vector<1x128xf32> to vector<1x128xf32>
    %6 = vector.broadcast %5 : vector<1x128xf32> to vector<8x128xf32>
    %c0_4 = arith.constant 0 : index
    %c0_5 = arith.constant 0 : index
    %c0_6 = arith.constant 0 : index
    %7 = vector.load %arg5[%c0_4, %c0_5, %c0_6] : memref<3x8x32xf32, #tpu.memory_space<vmem>>, vector<1x8x32xf32>
    %8 = vector.shape_cast %7 : vector<1x8x32xf32> to vector<8x32xf32>
    %c1 = arith.constant 1 : index
    %c0_7 = arith.constant 0 : index
    %c0_8 = arith.constant 0 : index
    %9 = vector.load %arg5[%c1, %c0_7, %c0_8] : memref<3x8x32xf32, #tpu.memory_space<vmem>>, vector<1x8x32xf32>
    %10 = vector.shape_cast %9 : vector<1x8x32xf32> to vector<8x32xf32>
    %c2 = arith.constant 2 : index
    %c0_9 = arith.constant 0 : index
    %c0_10 = arith.constant 0 : index
    %11 = vector.load %arg5[%c2, %c0_9, %c0_10] : memref<3x8x32xf32, #tpu.memory_space<vmem>>, vector<1x8x32xf32>
    %12 = vector.shape_cast %11 : vector<1x8x32xf32> to vector<8x32xf32>
    %c0_11 = arith.constant 0 : index
    %c0_12 = arith.constant 0 : index
    %13 = vector.load %arg6[%c0_11, %c0_12] : memref<8x128xf32, #tpu.memory_space<vmem>>, vector<8x128xf32>
    %c0_13 = arith.constant 0 : index
    %c0_14 = arith.constant 0 : index
    %c0_15 = arith.constant 0 : index
    %14 = vector.load %arg1[%c0_13, %c0_14, %c0_15] : memref<16x8x128xf32, #tpu.memory_space<vmem>>, vector<1x8x128xf32>
    %15 = vector.shape_cast %14 : vector<1x8x128xf32> to vector<8x128xf32>
    %16 = arith.addf %15, %13 : vector<8x128xf32>
    %17 = arith.negf %16 : vector<8x128xf32>
    %18 = math.exp %17 : vector<8x128xf32>
    %cst = arith.constant 1.000000e+00 : f32
    %19 = vector.broadcast %cst : f32 to vector<8x128xf32>
    %20 = arith.addf %19, %18 : vector<8x128xf32>
    %21 = arith.divf %19, %20 : vector<8x128xf32>
    %22 = math.tanh %16 : vector<8x128xf32>
    %23 = vector.extract_strided_slice %21 {offsets = [0, 32], sizes = [8, 32], strides = [1, 1]} : vector<8x128xf32> to vector<8x32xf32>
    %24 = arith.mulf %23, %8 : vector<8x32xf32>
    %25 = vector.extract_strided_slice %21 {offsets = [0, 0], sizes = [8, 32], strides = [1, 1]} : vector<8x128xf32> to vector<8x32xf32>
    %26 = vector.extract_strided_slice %22 {offsets = [0, 64], sizes = [8, 32], strides = [1, 1]} : vector<8x128xf32> to vector<8x32xf32>
    %27 = arith.mulf %25, %26 : vector<8x32xf32>
    %28 = arith.addf %24, %27 : vector<8x32xf32>
    %29 = vector.extract_strided_slice %21 {offsets = [0, 96], sizes = [8, 32], strides = [1, 1]} : vector<8x128xf32> to vector<8x32xf32>
    %30 = math.tanh %28 : vector<8x32xf32>
    %31 = arith.mulf %29, %30 : vector<8x32xf32>
    %32 = tpu.concatenate %31, %12 in 1 : vector<8x32xf32>, vector<8x32xf32> -> vector<8x64xf32>
    %cst_16 = arith.constant dense<0.000000e+00> : vector<8x256xf32>
    %33 = tpu.matmul %32, %3, %cst_16 {dimension_numbers = #tpu.dot_dimension_numbers<[1], [0], [0], [1], [0, 0, 1, 1], [], []>} : vector<8x64xf32>, vector<64x256xf32>, vector<8x256xf32> -> vector<8x256xf32>
    %34 = vector.extract_strided_slice %33 {offsets = [0, 0], sizes = [8, 128], strides = [1, 1]} : vector<8x256xf32> to vector<8x128xf32>
    %35 = arith.addf %34, %6 : vector<8x128xf32>
    %36 = vector.extract_strided_slice %33 {offsets = [0, 128], sizes = [8, 128], strides = [1, 1]} : vector<8x256xf32> to vector<8x128xf32>
    %37 = arith.negf %35 : vector<8x128xf32>
    %38 = math.exp %37 : vector<8x128xf32>
    %cst_17 = arith.constant 1.000000e+00 : f32
    %39 = vector.broadcast %cst_17 : f32 to vector<8x128xf32>
    %40 = arith.addf %39, %38 : vector<8x128xf32>
    %41 = arith.divf %39, %40 : vector<8x128xf32>
    %42 = math.tanh %35 : vector<8x128xf32>
    %43 = vector.extract_strided_slice %41 {offsets = [0, 32], sizes = [8, 32], strides = [1, 1]} : vector<8x128xf32> to vector<8x32xf32>
    %44 = arith.mulf %43, %10 : vector<8x32xf32>
    %45 = vector.extract_strided_slice %41 {offsets = [0, 0], sizes = [8, 32], strides = [1, 1]} : vector<8x128xf32> to vector<8x32xf32>
    %46 = vector.extract_strided_slice %42 {offsets = [0, 64], sizes = [8, 32], strides = [1, 1]} : vector<8x128xf32> to vector<8x32xf32>
    %47 = arith.mulf %45, %46 : vector<8x32xf32>
    %48 = arith.addf %44, %47 : vector<8x32xf32>
    %49 = vector.extract_strided_slice %41 {offsets = [0, 96], sizes = [8, 32], strides = [1, 1]} : vector<8x128xf32> to vector<8x32xf32>
    %50 = math.tanh %48 : vector<8x32xf32>
    %51 = arith.mulf %49, %50 : vector<8x32xf32>
    %c1_18 = arith.constant 1 : index
    %c0_19 = arith.constant 0 : index
    %c0_20 = arith.constant 0 : index
    %52 = vector.load %arg1[%c1_18, %c0_19, %c0_20] : memref<16x8x128xf32, #tpu.memory_space<vmem>>, vector<1x8x128xf32>
    %53 = vector.shape_cast %52 : vector<1x8x128xf32> to vector<8x128xf32>
    %54 = arith.addf %53, %36 : vector<8x128xf32>
    %55 = arith.negf %54 : vector<8x128xf32>
    %56 = math.exp %55 : vector<8x128xf32>
    %cst_21 = arith.constant 1.000000e+00 : f32
    %57 = vector.broadcast %cst_21 : f32 to vector<8x128xf32>
    %58 = arith.addf %57, %56 : vector<8x128xf32>
    %59 = arith.divf %57, %58 : vector<8x128xf32>
    %60 = math.tanh %54 : vector<8x128xf32>
    %61 = vector.extract_strided_slice %59 {offsets = [0, 32], sizes = [8, 32], strides = [1, 1]} : vector<8x128xf32> to vector<8x32xf32>
    %62 = arith.mulf %61, %28 : vector<8x32xf32>
    %63 = vector.extract_strided_slice %59 {offsets = [0, 0], sizes = [8, 32], strides = [1, 1]} : vector<8x128xf32> to vector<8x32xf32>
    %64 = vector.extract_strided_slice %60 {offsets = [0, 64], sizes = [8, 32], strides = [1, 1]} : vector<8x128xf32> to vector<8x32xf32>
    %65 = arith.mulf %63, %64 : vector<8x32xf32>
    %66 = arith.addf %62, %65 : vector<8x32xf32>
    %67 = vector.extract_strided_slice %59 {offsets = [0, 96], sizes = [8, 32], strides = [1, 1]} : vector<8x128xf32> to vector<8x32xf32>
    %68 = math.tanh %66 : vector<8x32xf32>
    %69 = arith.mulf %67, %68 : vector<8x32xf32>
    %70 = tpu.concatenate %69, %51 in 1 : vector<8x32xf32>, vector<8x32xf32> -> vector<8x64xf32>
    %cst_22 = arith.constant dense<0.000000e+00> : vector<8x256xf32>
    %71 = tpu.matmul %70, %3, %cst_22 {dimension_numbers = #tpu.dot_dimension_numbers<[1], [0], [0], [1], [0, 0, 1, 1], [], []>} : vector<8x64xf32>, vector<64x256xf32>, vector<8x256xf32> -> vector<8x256xf32>
    %72 = vector.extract_strided_slice %71 {offsets = [0, 0], sizes = [8, 128], strides = [1, 1]} : vector<8x256xf32> to vector<8x128xf32>
    %73 = arith.addf %72, %6 : vector<8x128xf32>
    %74 = vector.extract_strided_slice %71 {offsets = [0, 128], sizes = [8, 128], strides = [1, 1]} : vector<8x256xf32> to vector<8x128xf32>
    %75 = arith.negf %73 : vector<8x128xf32>
    %76 = math.exp %75 : vector<8x128xf32>
    %cst_23 = arith.constant 1.000000e+00 : f32
    %77 = vector.broadcast %cst_23 : f32 to vector<8x128xf32>
    %78 = arith.addf %77, %76 : vector<8x128xf32>
    %79 = arith.divf %77, %78 : vector<8x128xf32>
    %80 = math.tanh %73 : vector<8x128xf32>
    %81 = vector.extract_strided_slice %79 {offsets = [0, 32], sizes = [8, 32], strides = [1, 1]} : vector<8x128xf32> to vector<8x32xf32>
    %82 = arith.mulf %81, %48 : vector<8x32xf32>
    %83 = vector.extract_strided_slice %79 {offsets = [0, 0], sizes = [8, 32], strides = [1, 1]} : vector<8x128xf32> to vector<8x32xf32>
    %84 = vector.extract_strided_slice %80 {offsets = [0, 64], sizes = [8, 32], strides = [1, 1]} : vector<8x128xf32> to vector<8x32xf32>
    %85 = arith.mulf %83, %84 : vector<8x32xf32>
    %86 = arith.addf %82, %85 : vector<8x32xf32>
    %87 = vector.extract_strided_slice %79 {offsets = [0, 96], sizes = [8, 32], strides = [1, 1]} : vector<8x128xf32> to vector<8x32xf32>
    %88 = math.tanh %86 : vector<8x32xf32>
    %89 = arith.mulf %87, %88 : vector<8x32xf32>
    %c2_24 = arith.constant 2 : index
    %c0_25 = arith.constant 0 : index
    %c0_26 = arith.constant 0 : index
    %90 = vector.load %arg1[%c2_24, %c0_25, %c0_26] : memref<16x8x128xf32, #tpu.memory_space<vmem>>, vector<1x8x128xf32>
    %91 = vector.shape_cast %90 : vector<1x8x128xf32> to vector<8x128xf32>
    %92 = arith.addf %91, %74 : vector<8x128xf32>
    %93 = arith.negf %92 : vector<8x128xf32>
    %94 = math.exp %93 : vector<8x128xf32>
    %cst_27 = arith.constant 1.000000e+00 : f32
    %95 = vector.broadcast %cst_27 : f32 to vector<8x128xf32>
    %96 = arith.addf %95, %94 : vector<8x128xf32>
    %97 = arith.divf %95, %96 : vector<8x128xf32>
    %98 = math.tanh %92 : vector<8x128xf32>
    %99 = vector.extract_strided_slice %97 {offsets = [0, 32], sizes = [8, 32], strides = [1, 1]} : vector<8x128xf32> to vector<8x32xf32>
    %100 = arith.mulf %99, %66 : vector<8x32xf32>
    %101 = vector.extract_strided_slice %97 {offsets = [0, 0], sizes = [8, 32], strides = [1, 1]} : vector<8x128xf32> to vector<8x32xf32>
    %102 = vector.extract_strided_slice %98 {offsets = [0, 64], sizes = [8, 32], strides = [1, 1]} : vector<8x128xf32> to vector<8x32xf32>
    %103 = arith.mulf %101, %102 : vector<8x32xf32>
    %104 = arith.addf %100, %103 : vector<8x32xf32>
    %105 = vector.extract_strided_slice %97 {offsets = [0, 96], sizes = [8, 32], strides = [1, 1]} : vector<8x128xf32> to vector<8x32xf32>
    %106 = math.tanh %104 : vector<8x32xf32>
    %107 = arith.mulf %105, %106 : vector<8x32xf32>
    %108 = tpu.concatenate %107, %89 in 1 : vector<8x32xf32>, vector<8x32xf32> -> vector<8x64xf32>
    %cst_28 = arith.constant dense<0.000000e+00> : vector<8x256xf32>
    %109 = tpu.matmul %108, %3, %cst_28 {dimension_numbers = #tpu.dot_dimension_numbers<[1], [0], [0], [1], [0, 0, 1, 1], [], []>} : vector<8x64xf32>, vector<64x256xf32>, vector<8x256xf32> -> vector<8x256xf32>
    %110 = vector.extract_strided_slice %109 {offsets = [0, 0], sizes = [8, 128], strides = [1, 1]} : vector<8x256xf32> to vector<8x128xf32>
    %111 = arith.addf %110, %6 : vector<8x128xf32>
    %112 = vector.extract_strided_slice %109 {offsets = [0, 128], sizes = [8, 128], strides = [1, 1]} : vector<8x256xf32> to vector<8x128xf32>
    %113 = arith.negf %111 : vector<8x128xf32>
    %114 = math.exp %113 : vector<8x128xf32>
    %cst_29 = arith.constant 1.000000e+00 : f32
    %115 = vector.broadcast %cst_29 : f32 to vector<8x128xf32>
    %116 = arith.addf %115, %114 : vector<8x128xf32>
    %117 = arith.divf %115, %116 : vector<8x128xf32>
    %118 = math.tanh %111 : vector<8x128xf32>
    %119 = vector.extract_strided_slice %117 {offsets = [0, 32], sizes = [8, 32], strides = [1, 1]} : vector<8x128xf32> to vector<8x32xf32>
    %120 = arith.mulf %119, %86 : vector<8x32xf32>
    %121 = vector.extract_strided_slice %117 {offsets = [0, 0], sizes = [8, 32], strides = [1, 1]} : vector<8x128xf32> to vector<8x32xf32>
    %122 = vector.extract_strided_slice %118 {offsets = [0, 64], sizes = [8, 32], strides = [1, 1]} : vector<8x128xf32> to vector<8x32xf32>
    %123 = arith.mulf %121, %122 : vector<8x32xf32>
    %124 = arith.addf %120, %123 : vector<8x32xf32>
    %125 = vector.extract_strided_slice %117 {offsets = [0, 96], sizes = [8, 32], strides = [1, 1]} : vector<8x128xf32> to vector<8x32xf32>
    %126 = math.tanh %124 : vector<8x32xf32>
    %127 = arith.mulf %125, %126 : vector<8x32xf32>
    %c3 = arith.constant 3 : index
    %c0_30 = arith.constant 0 : index
    %c0_31 = arith.constant 0 : index
    %128 = vector.load %arg1[%c3, %c0_30, %c0_31] : memref<16x8x128xf32, #tpu.memory_space<vmem>>, vector<1x8x128xf32>
    %129 = vector.shape_cast %128 : vector<1x8x128xf32> to vector<8x128xf32>
    %130 = arith.addf %129, %112 : vector<8x128xf32>
    %131 = arith.negf %130 : vector<8x128xf32>
    %132 = math.exp %131 : vector<8x128xf32>
    %cst_32 = arith.constant 1.000000e+00 : f32
    %133 = vector.broadcast %cst_32 : f32 to vector<8x128xf32>
    %134 = arith.addf %133, %132 : vector<8x128xf32>
    %135 = arith.divf %133, %134 : vector<8x128xf32>
    %136 = math.tanh %130 : vector<8x128xf32>
    %137 = vector.extract_strided_slice %135 {offsets = [0, 32], sizes = [8, 32], strides = [1, 1]} : vector<8x128xf32> to vector<8x32xf32>
    %138 = arith.mulf %137, %104 : vector<8x32xf32>
    %139 = vector.extract_strided_slice %135 {offsets = [0, 0], sizes = [8, 32], strides = [1, 1]} : vector<8x128xf32> to vector<8x32xf32>
    %140 = vector.extract_strided_slice %136 {offsets = [0, 64], sizes = [8, 32], strides = [1, 1]} : vector<8x128xf32> to vector<8x32xf32>
    %141 = arith.mulf %139, %140 : vector<8x32xf32>
    %142 = arith.addf %138, %141 : vector<8x32xf32>
    %143 = vector.extract_strided_slice %135 {offsets = [0, 96], sizes = [8, 32], strides = [1, 1]} : vector<8x128xf32> to vector<8x32xf32>
    %144 = math.tanh %142 : vector<8x32xf32>
    %145 = arith.mulf %143, %144 : vector<8x32xf32>
    %146 = tpu.concatenate %145, %127 in 1 : vector<8x32xf32>, vector<8x32xf32> -> vector<8x64xf32>
    %cst_33 = arith.constant dense<0.000000e+00> : vector<8x256xf32>
    %147 = tpu.matmul %146, %3, %cst_33 {dimension_numbers = #tpu.dot_dimension_numbers<[1], [0], [0], [1], [0, 0, 1, 1], [], []>} : vector<8x64xf32>, vector<64x256xf32>, vector<8x256xf32> -> vector<8x256xf32>
    %148 = vector.extract_strided_slice %147 {offsets = [0, 0], sizes = [8, 128], strides = [1, 1]} : vector<8x256xf32> to vector<8x128xf32>
    %149 = arith.addf %148, %6 : vector<8x128xf32>
    %150 = vector.extract_strided_slice %147 {offsets = [0, 128], sizes = [8, 128], strides = [1, 1]} : vector<8x256xf32> to vector<8x128xf32>
    %151 = arith.negf %149 : vector<8x128xf32>
    %152 = math.exp %151 : vector<8x128xf32>
    %cst_34 = arith.constant 1.000000e+00 : f32
    %153 = vector.broadcast %cst_34 : f32 to vector<8x128xf32>
    %154 = arith.addf %153, %152 : vector<8x128xf32>
    %155 = arith.divf %153, %154 : vector<8x128xf32>
    %156 = math.tanh %149 : vector<8x128xf32>
    %157 = vector.extract_strided_slice %155 {offsets = [0, 32], sizes = [8, 32], strides = [1, 1]} : vector<8x128xf32> to vector<8x32xf32>
    %158 = arith.mulf %157, %124 : vector<8x32xf32>
    %159 = vector.extract_strided_slice %155 {offsets = [0, 0], sizes = [8, 32], strides = [1, 1]} : vector<8x128xf32> to vector<8x32xf32>
    %160 = vector.extract_strided_slice %156 {offsets = [0, 64], sizes = [8, 32], strides = [1, 1]} : vector<8x128xf32> to vector<8x32xf32>
    %161 = arith.mulf %159, %160 : vector<8x32xf32>
    %162 = arith.addf %158, %161 : vector<8x32xf32>
    %163 = vector.extract_strided_slice %155 {offsets = [0, 96], sizes = [8, 32], strides = [1, 1]} : vector<8x128xf32> to vector<8x32xf32>
    %164 = math.tanh %162 : vector<8x32xf32>
    %165 = arith.mulf %163, %164 : vector<8x32xf32>
    %c4 = arith.constant 4 : index
    %c0_35 = arith.constant 0 : index
    %c0_36 = arith.constant 0 : index
    %166 = vector.load %arg1[%c4, %c0_35, %c0_36] : memref<16x8x128xf32, #tpu.memory_space<vmem>>, vector<1x8x128xf32>
    %167 = vector.shape_cast %166 : vector<1x8x128xf32> to vector<8x128xf32>
    %168 = arith.addf %167, %150 : vector<8x128xf32>
    %169 = arith.negf %168 : vector<8x128xf32>
    %170 = math.exp %169 : vector<8x128xf32>
    %cst_37 = arith.constant 1.000000e+00 : f32
    %171 = vector.broadcast %cst_37 : f32 to vector<8x128xf32>
    %172 = arith.addf %171, %170 : vector<8x128xf32>
    %173 = arith.divf %171, %172 : vector<8x128xf32>
    %174 = math.tanh %168 : vector<8x128xf32>
    %175 = vector.extract_strided_slice %173 {offsets = [0, 32], sizes = [8, 32], strides = [1, 1]} : vector<8x128xf32> to vector<8x32xf32>
    %176 = arith.mulf %175, %142 : vector<8x32xf32>
    %177 = vector.extract_strided_slice %173 {offsets = [0, 0], sizes = [8, 32], strides = [1, 1]} : vector<8x128xf32> to vector<8x32xf32>
    %178 = vector.extract_strided_slice %174 {offsets = [0, 64], sizes = [8, 32], strides = [1, 1]} : vector<8x128xf32> to vector<8x32xf32>
    %179 = arith.mulf %177, %178 : vector<8x32xf32>
    %180 = arith.addf %176, %179 : vector<8x32xf32>
    %181 = vector.extract_strided_slice %173 {offsets = [0, 96], sizes = [8, 32], strides = [1, 1]} : vector<8x128xf32> to vector<8x32xf32>
    %182 = math.tanh %180 : vector<8x32xf32>
    %183 = arith.mulf %181, %182 : vector<8x32xf32>
    %184 = tpu.concatenate %183, %165 in 1 : vector<8x32xf32>, vector<8x32xf32> -> vector<8x64xf32>
    %cst_38 = arith.constant dense<0.000000e+00> : vector<8x256xf32>
    %185 = tpu.matmul %184, %3, %cst_38 {dimension_numbers = #tpu.dot_dimension_numbers<[1], [0], [0], [1], [0, 0, 1, 1], [], []>} : vector<8x64xf32>, vector<64x256xf32>, vector<8x256xf32> -> vector<8x256xf32>
    %186 = vector.extract_strided_slice %185 {offsets = [0, 0], sizes = [8, 128], strides = [1, 1]} : vector<8x256xf32> to vector<8x128xf32>
    %187 = arith.addf %186, %6 : vector<8x128xf32>
    %188 = vector.extract_strided_slice %185 {offsets = [0, 128], sizes = [8, 128], strides = [1, 1]} : vector<8x256xf32> to vector<8x128xf32>
    %189 = arith.negf %187 : vector<8x128xf32>
    %190 = math.exp %189 : vector<8x128xf32>
    %cst_39 = arith.constant 1.000000e+00 : f32
    %191 = vector.broadcast %cst_39 : f32 to vector<8x128xf32>
    %192 = arith.addf %191, %190 : vector<8x128xf32>
    %193 = arith.divf %191, %192 : vector<8x128xf32>
    %194 = math.tanh %187 : vector<8x128xf32>
    %195 = vector.extract_strided_slice %193 {offsets = [0, 32], sizes = [8, 32], strides = [1, 1]} : vector<8x128xf32> to vector<8x32xf32>
    %196 = arith.mulf %195, %162 : vector<8x32xf32>
    %197 = vector.extract_strided_slice %193 {offsets = [0, 0], sizes = [8, 32], strides = [1, 1]} : vector<8x128xf32> to vector<8x32xf32>
    %198 = vector.extract_strided_slice %194 {offsets = [0, 64], sizes = [8, 32], strides = [1, 1]} : vector<8x128xf32> to vector<8x32xf32>
    %199 = arith.mulf %197, %198 : vector<8x32xf32>
    %200 = arith.addf %196, %199 : vector<8x32xf32>
    %201 = vector.extract_strided_slice %193 {offsets = [0, 96], sizes = [8, 32], strides = [1, 1]} : vector<8x128xf32> to vector<8x32xf32>
    %202 = math.tanh %200 : vector<8x32xf32>
    %203 = arith.mulf %201, %202 : vector<8x32xf32>
    %c5 = arith.constant 5 : index
    %c0_40 = arith.constant 0 : index
    %c0_41 = arith.constant 0 : index
    %204 = vector.load %arg1[%c5, %c0_40, %c0_41] : memref<16x8x128xf32, #tpu.memory_space<vmem>>, vector<1x8x128xf32>
    %205 = vector.shape_cast %204 : vector<1x8x128xf32> to vector<8x128xf32>
    %206 = arith.addf %205, %188 : vector<8x128xf32>
    %207 = arith.negf %206 : vector<8x128xf32>
    %208 = math.exp %207 : vector<8x128xf32>
    %cst_42 = arith.constant 1.000000e+00 : f32
    %209 = vector.broadcast %cst_42 : f32 to vector<8x128xf32>
    %210 = arith.addf %209, %208 : vector<8x128xf32>
    %211 = arith.divf %209, %210 : vector<8x128xf32>
    %212 = math.tanh %206 : vector<8x128xf32>
    %213 = vector.extract_strided_slice %211 {offsets = [0, 32], sizes = [8, 32], strides = [1, 1]} : vector<8x128xf32> to vector<8x32xf32>
    %214 = arith.mulf %213, %180 : vector<8x32xf32>
    %215 = vector.extract_strided_slice %211 {offsets = [0, 0], sizes = [8, 32], strides = [1, 1]} : vector<8x128xf32> to vector<8x32xf32>
    %216 = vector.extract_strided_slice %212 {offsets = [0, 64], sizes = [8, 32], strides = [1, 1]} : vector<8x128xf32> to vector<8x32xf32>
    %217 = arith.mulf %215, %216 : vector<8x32xf32>
    %218 = arith.addf %214, %217 : vector<8x32xf32>
    %219 = vector.extract_strided_slice %211 {offsets = [0, 96], sizes = [8, 32], strides = [1, 1]} : vector<8x128xf32> to vector<8x32xf32>
    %220 = math.tanh %218 : vector<8x32xf32>
    %221 = arith.mulf %219, %220 : vector<8x32xf32>
    %222 = tpu.concatenate %221, %203 in 1 : vector<8x32xf32>, vector<8x32xf32> -> vector<8x64xf32>
    %cst_43 = arith.constant dense<0.000000e+00> : vector<8x256xf32>
    %223 = tpu.matmul %222, %3, %cst_43 {dimension_numbers = #tpu.dot_dimension_numbers<[1], [0], [0], [1], [0, 0, 1, 1], [], []>} : vector<8x64xf32>, vector<64x256xf32>, vector<8x256xf32> -> vector<8x256xf32>
    %224 = vector.extract_strided_slice %223 {offsets = [0, 0], sizes = [8, 128], strides = [1, 1]} : vector<8x256xf32> to vector<8x128xf32>
    %225 = arith.addf %224, %6 : vector<8x128xf32>
    %226 = vector.extract_strided_slice %223 {offsets = [0, 128], sizes = [8, 128], strides = [1, 1]} : vector<8x256xf32> to vector<8x128xf32>
    %227 = arith.negf %225 : vector<8x128xf32>
    %228 = math.exp %227 : vector<8x128xf32>
    %cst_44 = arith.constant 1.000000e+00 : f32
    %229 = vector.broadcast %cst_44 : f32 to vector<8x128xf32>
    %230 = arith.addf %229, %228 : vector<8x128xf32>
    %231 = arith.divf %229, %230 : vector<8x128xf32>
    %232 = math.tanh %225 : vector<8x128xf32>
    %233 = vector.extract_strided_slice %231 {offsets = [0, 32], sizes = [8, 32], strides = [1, 1]} : vector<8x128xf32> to vector<8x32xf32>
    %234 = arith.mulf %233, %200 : vector<8x32xf32>
    %235 = vector.extract_strided_slice %231 {offsets = [0, 0], sizes = [8, 32], strides = [1, 1]} : vector<8x128xf32> to vector<8x32xf32>
    %236 = vector.extract_strided_slice %232 {offsets = [0, 64], sizes = [8, 32], strides = [1, 1]} : vector<8x128xf32> to vector<8x32xf32>
    %237 = arith.mulf %235, %236 : vector<8x32xf32>
    %238 = arith.addf %234, %237 : vector<8x32xf32>
    %239 = vector.extract_strided_slice %231 {offsets = [0, 96], sizes = [8, 32], strides = [1, 1]} : vector<8x128xf32> to vector<8x32xf32>
    %240 = math.tanh %238 : vector<8x32xf32>
    %241 = arith.mulf %239, %240 : vector<8x32xf32>
    %c6 = arith.constant 6 : index
    %c0_45 = arith.constant 0 : index
    %c0_46 = arith.constant 0 : index
    %242 = vector.load %arg1[%c6, %c0_45, %c0_46] : memref<16x8x128xf32, #tpu.memory_space<vmem>>, vector<1x8x128xf32>
    %243 = vector.shape_cast %242 : vector<1x8x128xf32> to vector<8x128xf32>
    %244 = arith.addf %243, %226 : vector<8x128xf32>
    %245 = arith.negf %244 : vector<8x128xf32>
    %246 = math.exp %245 : vector<8x128xf32>
    %cst_47 = arith.constant 1.000000e+00 : f32
    %247 = vector.broadcast %cst_47 : f32 to vector<8x128xf32>
    %248 = arith.addf %247, %246 : vector<8x128xf32>
    %249 = arith.divf %247, %248 : vector<8x128xf32>
    %250 = math.tanh %244 : vector<8x128xf32>
    %251 = vector.extract_strided_slice %249 {offsets = [0, 32], sizes = [8, 32], strides = [1, 1]} : vector<8x128xf32> to vector<8x32xf32>
    %252 = arith.mulf %251, %218 : vector<8x32xf32>
    %253 = vector.extract_strided_slice %249 {offsets = [0, 0], sizes = [8, 32], strides = [1, 1]} : vector<8x128xf32> to vector<8x32xf32>
    %254 = vector.extract_strided_slice %250 {offsets = [0, 64], sizes = [8, 32], strides = [1, 1]} : vector<8x128xf32> to vector<8x32xf32>
    %255 = arith.mulf %253, %254 : vector<8x32xf32>
    %256 = arith.addf %252, %255 : vector<8x32xf32>
    %257 = vector.extract_strided_slice %249 {offsets = [0, 96], sizes = [8, 32], strides = [1, 1]} : vector<8x128xf32> to vector<8x32xf32>
    %258 = math.tanh %256 : vector<8x32xf32>
    %259 = arith.mulf %257, %258 : vector<8x32xf32>
    %260 = tpu.concatenate %259, %241 in 1 : vector<8x32xf32>, vector<8x32xf32> -> vector<8x64xf32>
    %cst_48 = arith.constant dense<0.000000e+00> : vector<8x256xf32>
    %261 = tpu.matmul %260, %3, %cst_48 {dimension_numbers = #tpu.dot_dimension_numbers<[1], [0], [0], [1], [0, 0, 1, 1], [], []>} : vector<8x64xf32>, vector<64x256xf32>, vector<8x256xf32> -> vector<8x256xf32>
    %262 = vector.extract_strided_slice %261 {offsets = [0, 0], sizes = [8, 128], strides = [1, 1]} : vector<8x256xf32> to vector<8x128xf32>
    %263 = arith.addf %262, %6 : vector<8x128xf32>
    %264 = vector.extract_strided_slice %261 {offsets = [0, 128], sizes = [8, 128], strides = [1, 1]} : vector<8x256xf32> to vector<8x128xf32>
    %265 = arith.negf %263 : vector<8x128xf32>
    %266 = math.exp %265 : vector<8x128xf32>
    %cst_49 = arith.constant 1.000000e+00 : f32
    %267 = vector.broadcast %cst_49 : f32 to vector<8x128xf32>
    %268 = arith.addf %267, %266 : vector<8x128xf32>
    %269 = arith.divf %267, %268 : vector<8x128xf32>
    %270 = math.tanh %263 : vector<8x128xf32>
    %271 = vector.extract_strided_slice %269 {offsets = [0, 32], sizes = [8, 32], strides = [1, 1]} : vector<8x128xf32> to vector<8x32xf32>
    %272 = arith.mulf %271, %238 : vector<8x32xf32>
    %273 = vector.extract_strided_slice %269 {offsets = [0, 0], sizes = [8, 32], strides = [1, 1]} : vector<8x128xf32> to vector<8x32xf32>
    %274 = vector.extract_strided_slice %270 {offsets = [0, 64], sizes = [8, 32], strides = [1, 1]} : vector<8x128xf32> to vector<8x32xf32>
    %275 = arith.mulf %273, %274 : vector<8x32xf32>
    %276 = arith.addf %272, %275 : vector<8x32xf32>
    %277 = vector.extract_strided_slice %269 {offsets = [0, 96], sizes = [8, 32], strides = [1, 1]} : vector<8x128xf32> to vector<8x32xf32>
    %278 = math.tanh %276 : vector<8x32xf32>
    %279 = arith.mulf %277, %278 : vector<8x32xf32>
    %c7 = arith.constant 7 : index
    %c0_50 = arith.constant 0 : index
    %c0_51 = arith.constant 0 : index
    %280 = vector.load %arg1[%c7, %c0_50, %c0_51] : memref<16x8x128xf32, #tpu.memory_space<vmem>>, vector<1x8x128xf32>
    %281 = vector.shape_cast %280 : vector<1x8x128xf32> to vector<8x128xf32>
    %282 = arith.addf %281, %264 : vector<8x128xf32>
    %283 = arith.negf %282 : vector<8x128xf32>
    %284 = math.exp %283 : vector<8x128xf32>
    %cst_52 = arith.constant 1.000000e+00 : f32
    %285 = vector.broadcast %cst_52 : f32 to vector<8x128xf32>
    %286 = arith.addf %285, %284 : vector<8x128xf32>
    %287 = arith.divf %285, %286 : vector<8x128xf32>
    %288 = math.tanh %282 : vector<8x128xf32>
    %289 = vector.extract_strided_slice %287 {offsets = [0, 32], sizes = [8, 32], strides = [1, 1]} : vector<8x128xf32> to vector<8x32xf32>
    %290 = arith.mulf %289, %256 : vector<8x32xf32>
    %291 = vector.extract_strided_slice %287 {offsets = [0, 0], sizes = [8, 32], strides = [1, 1]} : vector<8x128xf32> to vector<8x32xf32>
    %292 = vector.extract_strided_slice %288 {offsets = [0, 64], sizes = [8, 32], strides = [1, 1]} : vector<8x128xf32> to vector<8x32xf32>
    %293 = arith.mulf %291, %292 : vector<8x32xf32>
    %294 = arith.addf %290, %293 : vector<8x32xf32>
    %295 = vector.extract_strided_slice %287 {offsets = [0, 96], sizes = [8, 32], strides = [1, 1]} : vector<8x128xf32> to vector<8x32xf32>
    %296 = math.tanh %294 : vector<8x32xf32>
    %297 = arith.mulf %295, %296 : vector<8x32xf32>
    %298 = tpu.concatenate %297, %279 in 1 : vector<8x32xf32>, vector<8x32xf32> -> vector<8x64xf32>
    %cst_53 = arith.constant dense<0.000000e+00> : vector<8x256xf32>
    %299 = tpu.matmul %298, %3, %cst_53 {dimension_numbers = #tpu.dot_dimension_numbers<[1], [0], [0], [1], [0, 0, 1, 1], [], []>} : vector<8x64xf32>, vector<64x256xf32>, vector<8x256xf32> -> vector<8x256xf32>
    %300 = vector.extract_strided_slice %299 {offsets = [0, 0], sizes = [8, 128], strides = [1, 1]} : vector<8x256xf32> to vector<8x128xf32>
    %301 = arith.addf %300, %6 : vector<8x128xf32>
    %302 = vector.extract_strided_slice %299 {offsets = [0, 128], sizes = [8, 128], strides = [1, 1]} : vector<8x256xf32> to vector<8x128xf32>
    %303 = arith.negf %301 : vector<8x128xf32>
    %304 = math.exp %303 : vector<8x128xf32>
    %cst_54 = arith.constant 1.000000e+00 : f32
    %305 = vector.broadcast %cst_54 : f32 to vector<8x128xf32>
    %306 = arith.addf %305, %304 : vector<8x128xf32>
    %307 = arith.divf %305, %306 : vector<8x128xf32>
    %308 = math.tanh %301 : vector<8x128xf32>
    %309 = vector.extract_strided_slice %307 {offsets = [0, 32], sizes = [8, 32], strides = [1, 1]} : vector<8x128xf32> to vector<8x32xf32>
    %310 = arith.mulf %309, %276 : vector<8x32xf32>
    %311 = vector.extract_strided_slice %307 {offsets = [0, 0], sizes = [8, 32], strides = [1, 1]} : vector<8x128xf32> to vector<8x32xf32>
    %312 = vector.extract_strided_slice %308 {offsets = [0, 64], sizes = [8, 32], strides = [1, 1]} : vector<8x128xf32> to vector<8x32xf32>
    %313 = arith.mulf %311, %312 : vector<8x32xf32>
    %314 = arith.addf %310, %313 : vector<8x32xf32>
    %315 = vector.extract_strided_slice %307 {offsets = [0, 96], sizes = [8, 32], strides = [1, 1]} : vector<8x128xf32> to vector<8x32xf32>
    %316 = math.tanh %314 : vector<8x32xf32>
    %317 = arith.mulf %315, %316 : vector<8x32xf32>
    %c8 = arith.constant 8 : index
    %c0_55 = arith.constant 0 : index
    %c0_56 = arith.constant 0 : index
    %318 = vector.load %arg1[%c8, %c0_55, %c0_56] : memref<16x8x128xf32, #tpu.memory_space<vmem>>, vector<1x8x128xf32>
    %319 = vector.shape_cast %318 : vector<1x8x128xf32> to vector<8x128xf32>
    %320 = arith.addf %319, %302 : vector<8x128xf32>
    %321 = arith.negf %320 : vector<8x128xf32>
    %322 = math.exp %321 : vector<8x128xf32>
    %cst_57 = arith.constant 1.000000e+00 : f32
    %323 = vector.broadcast %cst_57 : f32 to vector<8x128xf32>
    %324 = arith.addf %323, %322 : vector<8x128xf32>
    %325 = arith.divf %323, %324 : vector<8x128xf32>
    %326 = math.tanh %320 : vector<8x128xf32>
    %327 = vector.extract_strided_slice %325 {offsets = [0, 32], sizes = [8, 32], strides = [1, 1]} : vector<8x128xf32> to vector<8x32xf32>
    %328 = arith.mulf %327, %294 : vector<8x32xf32>
    %329 = vector.extract_strided_slice %325 {offsets = [0, 0], sizes = [8, 32], strides = [1, 1]} : vector<8x128xf32> to vector<8x32xf32>
    %330 = vector.extract_strided_slice %326 {offsets = [0, 64], sizes = [8, 32], strides = [1, 1]} : vector<8x128xf32> to vector<8x32xf32>
    %331 = arith.mulf %329, %330 : vector<8x32xf32>
    %332 = arith.addf %328, %331 : vector<8x32xf32>
    %333 = vector.extract_strided_slice %325 {offsets = [0, 96], sizes = [8, 32], strides = [1, 1]} : vector<8x128xf32> to vector<8x32xf32>
    %334 = math.tanh %332 : vector<8x32xf32>
    %335 = arith.mulf %333, %334 : vector<8x32xf32>
    %336 = tpu.concatenate %335, %317 in 1 : vector<8x32xf32>, vector<8x32xf32> -> vector<8x64xf32>
    %cst_58 = arith.constant dense<0.000000e+00> : vector<8x256xf32>
    %337 = tpu.matmul %336, %3, %cst_58 {dimension_numbers = #tpu.dot_dimension_numbers<[1], [0], [0], [1], [0, 0, 1, 1], [], []>} : vector<8x64xf32>, vector<64x256xf32>, vector<8x256xf32> -> vector<8x256xf32>
    %338 = vector.extract_strided_slice %337 {offsets = [0, 0], sizes = [8, 128], strides = [1, 1]} : vector<8x256xf32> to vector<8x128xf32>
    %339 = arith.addf %338, %6 : vector<8x128xf32>
    %340 = vector.extract_strided_slice %337 {offsets = [0, 128], sizes = [8, 128], strides = [1, 1]} : vector<8x256xf32> to vector<8x128xf32>
    %341 = arith.negf %339 : vector<8x128xf32>
    %342 = math.exp %341 : vector<8x128xf32>
    %cst_59 = arith.constant 1.000000e+00 : f32
    %343 = vector.broadcast %cst_59 : f32 to vector<8x128xf32>
    %344 = arith.addf %343, %342 : vector<8x128xf32>
    %345 = arith.divf %343, %344 : vector<8x128xf32>
    %346 = math.tanh %339 : vector<8x128xf32>
    %347 = vector.extract_strided_slice %345 {offsets = [0, 32], sizes = [8, 32], strides = [1, 1]} : vector<8x128xf32> to vector<8x32xf32>
    %348 = arith.mulf %347, %314 : vector<8x32xf32>
    %349 = vector.extract_strided_slice %345 {offsets = [0, 0], sizes = [8, 32], strides = [1, 1]} : vector<8x128xf32> to vector<8x32xf32>
    %350 = vector.extract_strided_slice %346 {offsets = [0, 64], sizes = [8, 32], strides = [1, 1]} : vector<8x128xf32> to vector<8x32xf32>
    %351 = arith.mulf %349, %350 : vector<8x32xf32>
    %352 = arith.addf %348, %351 : vector<8x32xf32>
    %353 = vector.extract_strided_slice %345 {offsets = [0, 96], sizes = [8, 32], strides = [1, 1]} : vector<8x128xf32> to vector<8x32xf32>
    %354 = math.tanh %352 : vector<8x32xf32>
    %355 = arith.mulf %353, %354 : vector<8x32xf32>
    %c9 = arith.constant 9 : index
    %c0_60 = arith.constant 0 : index
    %c0_61 = arith.constant 0 : index
    %356 = vector.load %arg1[%c9, %c0_60, %c0_61] : memref<16x8x128xf32, #tpu.memory_space<vmem>>, vector<1x8x128xf32>
    %357 = vector.shape_cast %356 : vector<1x8x128xf32> to vector<8x128xf32>
    %358 = arith.addf %357, %340 : vector<8x128xf32>
    %359 = arith.negf %358 : vector<8x128xf32>
    %360 = math.exp %359 : vector<8x128xf32>
    %cst_62 = arith.constant 1.000000e+00 : f32
    %361 = vector.broadcast %cst_62 : f32 to vector<8x128xf32>
    %362 = arith.addf %361, %360 : vector<8x128xf32>
    %363 = arith.divf %361, %362 : vector<8x128xf32>
    %364 = math.tanh %358 : vector<8x128xf32>
    %365 = vector.extract_strided_slice %363 {offsets = [0, 32], sizes = [8, 32], strides = [1, 1]} : vector<8x128xf32> to vector<8x32xf32>
    %366 = arith.mulf %365, %332 : vector<8x32xf32>
    %367 = vector.extract_strided_slice %363 {offsets = [0, 0], sizes = [8, 32], strides = [1, 1]} : vector<8x128xf32> to vector<8x32xf32>
    %368 = vector.extract_strided_slice %364 {offsets = [0, 64], sizes = [8, 32], strides = [1, 1]} : vector<8x128xf32> to vector<8x32xf32>
    %369 = arith.mulf %367, %368 : vector<8x32xf32>
    %370 = arith.addf %366, %369 : vector<8x32xf32>
    %371 = vector.extract_strided_slice %363 {offsets = [0, 96], sizes = [8, 32], strides = [1, 1]} : vector<8x128xf32> to vector<8x32xf32>
    %372 = math.tanh %370 : vector<8x32xf32>
    %373 = arith.mulf %371, %372 : vector<8x32xf32>
    %374 = tpu.concatenate %373, %355 in 1 : vector<8x32xf32>, vector<8x32xf32> -> vector<8x64xf32>
    %cst_63 = arith.constant dense<0.000000e+00> : vector<8x256xf32>
    %375 = tpu.matmul %374, %3, %cst_63 {dimension_numbers = #tpu.dot_dimension_numbers<[1], [0], [0], [1], [0, 0, 1, 1], [], []>} : vector<8x64xf32>, vector<64x256xf32>, vector<8x256xf32> -> vector<8x256xf32>
    %376 = vector.extract_strided_slice %375 {offsets = [0, 0], sizes = [8, 128], strides = [1, 1]} : vector<8x256xf32> to vector<8x128xf32>
    %377 = arith.addf %376, %6 : vector<8x128xf32>
    %378 = vector.extract_strided_slice %375 {offsets = [0, 128], sizes = [8, 128], strides = [1, 1]} : vector<8x256xf32> to vector<8x128xf32>
    %379 = arith.negf %377 : vector<8x128xf32>
    %380 = math.exp %379 : vector<8x128xf32>
    %cst_64 = arith.constant 1.000000e+00 : f32
    %381 = vector.broadcast %cst_64 : f32 to vector<8x128xf32>
    %382 = arith.addf %381, %380 : vector<8x128xf32>
    %383 = arith.divf %381, %382 : vector<8x128xf32>
    %384 = math.tanh %377 : vector<8x128xf32>
    %385 = vector.extract_strided_slice %383 {offsets = [0, 32], sizes = [8, 32], strides = [1, 1]} : vector<8x128xf32> to vector<8x32xf32>
    %386 = arith.mulf %385, %352 : vector<8x32xf32>
    %387 = vector.extract_strided_slice %383 {offsets = [0, 0], sizes = [8, 32], strides = [1, 1]} : vector<8x128xf32> to vector<8x32xf32>
    %388 = vector.extract_strided_slice %384 {offsets = [0, 64], sizes = [8, 32], strides = [1, 1]} : vector<8x128xf32> to vector<8x32xf32>
    %389 = arith.mulf %387, %388 : vector<8x32xf32>
    %390 = arith.addf %386, %389 : vector<8x32xf32>
    %391 = vector.extract_strided_slice %383 {offsets = [0, 96], sizes = [8, 32], strides = [1, 1]} : vector<8x128xf32> to vector<8x32xf32>
    %392 = math.tanh %390 : vector<8x32xf32>
    %393 = arith.mulf %391, %392 : vector<8x32xf32>
    %c10 = arith.constant 10 : index
    %c0_65 = arith.constant 0 : index
    %c0_66 = arith.constant 0 : index
    %394 = vector.load %arg1[%c10, %c0_65, %c0_66] : memref<16x8x128xf32, #tpu.memory_space<vmem>>, vector<1x8x128xf32>
    %395 = vector.shape_cast %394 : vector<1x8x128xf32> to vector<8x128xf32>
    %396 = arith.addf %395, %378 : vector<8x128xf32>
    %397 = arith.negf %396 : vector<8x128xf32>
    %398 = math.exp %397 : vector<8x128xf32>
    %cst_67 = arith.constant 1.000000e+00 : f32
    %399 = vector.broadcast %cst_67 : f32 to vector<8x128xf32>
    %400 = arith.addf %399, %398 : vector<8x128xf32>
    %401 = arith.divf %399, %400 : vector<8x128xf32>
    %402 = math.tanh %396 : vector<8x128xf32>
    %403 = vector.extract_strided_slice %401 {offsets = [0, 32], sizes = [8, 32], strides = [1, 1]} : vector<8x128xf32> to vector<8x32xf32>
    %404 = arith.mulf %403, %370 : vector<8x32xf32>
    %405 = vector.extract_strided_slice %401 {offsets = [0, 0], sizes = [8, 32], strides = [1, 1]} : vector<8x128xf32> to vector<8x32xf32>
    %406 = vector.extract_strided_slice %402 {offsets = [0, 64], sizes = [8, 32], strides = [1, 1]} : vector<8x128xf32> to vector<8x32xf32>
    %407 = arith.mulf %405, %406 : vector<8x32xf32>
    %408 = arith.addf %404, %407 : vector<8x32xf32>
    %409 = vector.extract_strided_slice %401 {offsets = [0, 96], sizes = [8, 32], strides = [1, 1]} : vector<8x128xf32> to vector<8x32xf32>
    %410 = math.tanh %408 : vector<8x32xf32>
    %411 = arith.mulf %409, %410 : vector<8x32xf32>
    %412 = tpu.concatenate %411, %393 in 1 : vector<8x32xf32>, vector<8x32xf32> -> vector<8x64xf32>
    %cst_68 = arith.constant dense<0.000000e+00> : vector<8x256xf32>
    %413 = tpu.matmul %412, %3, %cst_68 {dimension_numbers = #tpu.dot_dimension_numbers<[1], [0], [0], [1], [0, 0, 1, 1], [], []>} : vector<8x64xf32>, vector<64x256xf32>, vector<8x256xf32> -> vector<8x256xf32>
    %414 = vector.extract_strided_slice %413 {offsets = [0, 0], sizes = [8, 128], strides = [1, 1]} : vector<8x256xf32> to vector<8x128xf32>
    %415 = arith.addf %414, %6 : vector<8x128xf32>
    %416 = vector.extract_strided_slice %413 {offsets = [0, 128], sizes = [8, 128], strides = [1, 1]} : vector<8x256xf32> to vector<8x128xf32>
    %417 = arith.negf %415 : vector<8x128xf32>
    %418 = math.exp %417 : vector<8x128xf32>
    %cst_69 = arith.constant 1.000000e+00 : f32
    %419 = vector.broadcast %cst_69 : f32 to vector<8x128xf32>
    %420 = arith.addf %419, %418 : vector<8x128xf32>
    %421 = arith.divf %419, %420 : vector<8x128xf32>
    %422 = math.tanh %415 : vector<8x128xf32>
    %423 = vector.extract_strided_slice %421 {offsets = [0, 32], sizes = [8, 32], strides = [1, 1]} : vector<8x128xf32> to vector<8x32xf32>
    %424 = arith.mulf %423, %390 : vector<8x32xf32>
    %425 = vector.extract_strided_slice %421 {offsets = [0, 0], sizes = [8, 32], strides = [1, 1]} : vector<8x128xf32> to vector<8x32xf32>
    %426 = vector.extract_strided_slice %422 {offsets = [0, 64], sizes = [8, 32], strides = [1, 1]} : vector<8x128xf32> to vector<8x32xf32>
    %427 = arith.mulf %425, %426 : vector<8x32xf32>
    %428 = arith.addf %424, %427 : vector<8x32xf32>
    %429 = vector.extract_strided_slice %421 {offsets = [0, 96], sizes = [8, 32], strides = [1, 1]} : vector<8x128xf32> to vector<8x32xf32>
    %430 = math.tanh %428 : vector<8x32xf32>
    %431 = arith.mulf %429, %430 : vector<8x32xf32>
    %c11 = arith.constant 11 : index
    %c0_70 = arith.constant 0 : index
    %c0_71 = arith.constant 0 : index
    %432 = vector.load %arg1[%c11, %c0_70, %c0_71] : memref<16x8x128xf32, #tpu.memory_space<vmem>>, vector<1x8x128xf32>
    %433 = vector.shape_cast %432 : vector<1x8x128xf32> to vector<8x128xf32>
    %434 = arith.addf %433, %416 : vector<8x128xf32>
    %435 = arith.negf %434 : vector<8x128xf32>
    %436 = math.exp %435 : vector<8x128xf32>
    %cst_72 = arith.constant 1.000000e+00 : f32
    %437 = vector.broadcast %cst_72 : f32 to vector<8x128xf32>
    %438 = arith.addf %437, %436 : vector<8x128xf32>
    %439 = arith.divf %437, %438 : vector<8x128xf32>
    %440 = math.tanh %434 : vector<8x128xf32>
    %441 = vector.extract_strided_slice %439 {offsets = [0, 32], sizes = [8, 32], strides = [1, 1]} : vector<8x128xf32> to vector<8x32xf32>
    %442 = arith.mulf %441, %408 : vector<8x32xf32>
    %443 = vector.extract_strided_slice %439 {offsets = [0, 0], sizes = [8, 32], strides = [1, 1]} : vector<8x128xf32> to vector<8x32xf32>
    %444 = vector.extract_strided_slice %440 {offsets = [0, 64], sizes = [8, 32], strides = [1, 1]} : vector<8x128xf32> to vector<8x32xf32>
    %445 = arith.mulf %443, %444 : vector<8x32xf32>
    %446 = arith.addf %442, %445 : vector<8x32xf32>
    %447 = vector.extract_strided_slice %439 {offsets = [0, 96], sizes = [8, 32], strides = [1, 1]} : vector<8x128xf32> to vector<8x32xf32>
    %448 = math.tanh %446 : vector<8x32xf32>
    %449 = arith.mulf %447, %448 : vector<8x32xf32>
    %450 = tpu.concatenate %449, %431 in 1 : vector<8x32xf32>, vector<8x32xf32> -> vector<8x64xf32>
    %cst_73 = arith.constant dense<0.000000e+00> : vector<8x256xf32>
    %451 = tpu.matmul %450, %3, %cst_73 {dimension_numbers = #tpu.dot_dimension_numbers<[1], [0], [0], [1], [0, 0, 1, 1], [], []>} : vector<8x64xf32>, vector<64x256xf32>, vector<8x256xf32> -> vector<8x256xf32>
    %452 = vector.extract_strided_slice %451 {offsets = [0, 0], sizes = [8, 128], strides = [1, 1]} : vector<8x256xf32> to vector<8x128xf32>
    %453 = arith.addf %452, %6 : vector<8x128xf32>
    %454 = vector.extract_strided_slice %451 {offsets = [0, 128], sizes = [8, 128], strides = [1, 1]} : vector<8x256xf32> to vector<8x128xf32>
    %455 = arith.negf %453 : vector<8x128xf32>
    %456 = math.exp %455 : vector<8x128xf32>
    %cst_74 = arith.constant 1.000000e+00 : f32
    %457 = vector.broadcast %cst_74 : f32 to vector<8x128xf32>
    %458 = arith.addf %457, %456 : vector<8x128xf32>
    %459 = arith.divf %457, %458 : vector<8x128xf32>
    %460 = math.tanh %453 : vector<8x128xf32>
    %461 = vector.extract_strided_slice %459 {offsets = [0, 32], sizes = [8, 32], strides = [1, 1]} : vector<8x128xf32> to vector<8x32xf32>
    %462 = arith.mulf %461, %428 : vector<8x32xf32>
    %463 = vector.extract_strided_slice %459 {offsets = [0, 0], sizes = [8, 32], strides = [1, 1]} : vector<8x128xf32> to vector<8x32xf32>
    %464 = vector.extract_strided_slice %460 {offsets = [0, 64], sizes = [8, 32], strides = [1, 1]} : vector<8x128xf32> to vector<8x32xf32>
    %465 = arith.mulf %463, %464 : vector<8x32xf32>
    %466 = arith.addf %462, %465 : vector<8x32xf32>
    %467 = vector.extract_strided_slice %459 {offsets = [0, 96], sizes = [8, 32], strides = [1, 1]} : vector<8x128xf32> to vector<8x32xf32>
    %468 = math.tanh %466 : vector<8x32xf32>
    %469 = arith.mulf %467, %468 : vector<8x32xf32>
    %c12 = arith.constant 12 : index
    %c0_75 = arith.constant 0 : index
    %c0_76 = arith.constant 0 : index
    %470 = vector.load %arg1[%c12, %c0_75, %c0_76] : memref<16x8x128xf32, #tpu.memory_space<vmem>>, vector<1x8x128xf32>
    %471 = vector.shape_cast %470 : vector<1x8x128xf32> to vector<8x128xf32>
    %472 = arith.addf %471, %454 : vector<8x128xf32>
    %473 = arith.negf %472 : vector<8x128xf32>
    %474 = math.exp %473 : vector<8x128xf32>
    %cst_77 = arith.constant 1.000000e+00 : f32
    %475 = vector.broadcast %cst_77 : f32 to vector<8x128xf32>
    %476 = arith.addf %475, %474 : vector<8x128xf32>
    %477 = arith.divf %475, %476 : vector<8x128xf32>
    %478 = math.tanh %472 : vector<8x128xf32>
    %479 = vector.extract_strided_slice %477 {offsets = [0, 32], sizes = [8, 32], strides = [1, 1]} : vector<8x128xf32> to vector<8x32xf32>
    %480 = arith.mulf %479, %446 : vector<8x32xf32>
    %481 = vector.extract_strided_slice %477 {offsets = [0, 0], sizes = [8, 32], strides = [1, 1]} : vector<8x128xf32> to vector<8x32xf32>
    %482 = vector.extract_strided_slice %478 {offsets = [0, 64], sizes = [8, 32], strides = [1, 1]} : vector<8x128xf32> to vector<8x32xf32>
    %483 = arith.mulf %481, %482 : vector<8x32xf32>
    %484 = arith.addf %480, %483 : vector<8x32xf32>
    %485 = vector.extract_strided_slice %477 {offsets = [0, 96], sizes = [8, 32], strides = [1, 1]} : vector<8x128xf32> to vector<8x32xf32>
    %486 = math.tanh %484 : vector<8x32xf32>
    %487 = arith.mulf %485, %486 : vector<8x32xf32>
    %488 = tpu.concatenate %487, %469 in 1 : vector<8x32xf32>, vector<8x32xf32> -> vector<8x64xf32>
    %cst_78 = arith.constant dense<0.000000e+00> : vector<8x256xf32>
    %489 = tpu.matmul %488, %3, %cst_78 {dimension_numbers = #tpu.dot_dimension_numbers<[1], [0], [0], [1], [0, 0, 1, 1], [], []>} : vector<8x64xf32>, vector<64x256xf32>, vector<8x256xf32> -> vector<8x256xf32>
    %490 = vector.extract_strided_slice %489 {offsets = [0, 0], sizes = [8, 128], strides = [1, 1]} : vector<8x256xf32> to vector<8x128xf32>
    %491 = arith.addf %490, %6 : vector<8x128xf32>
    %492 = vector.extract_strided_slice %489 {offsets = [0, 128], sizes = [8, 128], strides = [1, 1]} : vector<8x256xf32> to vector<8x128xf32>
    %493 = arith.negf %491 : vector<8x128xf32>
    %494 = math.exp %493 : vector<8x128xf32>
    %cst_79 = arith.constant 1.000000e+00 : f32
    %495 = vector.broadcast %cst_79 : f32 to vector<8x128xf32>
    %496 = arith.addf %495, %494 : vector<8x128xf32>
    %497 = arith.divf %495, %496 : vector<8x128xf32>
    %498 = math.tanh %491 : vector<8x128xf32>
    %499 = vector.extract_strided_slice %497 {offsets = [0, 32], sizes = [8, 32], strides = [1, 1]} : vector<8x128xf32> to vector<8x32xf32>
    %500 = arith.mulf %499, %466 : vector<8x32xf32>
    %501 = vector.extract_strided_slice %497 {offsets = [0, 0], sizes = [8, 32], strides = [1, 1]} : vector<8x128xf32> to vector<8x32xf32>
    %502 = vector.extract_strided_slice %498 {offsets = [0, 64], sizes = [8, 32], strides = [1, 1]} : vector<8x128xf32> to vector<8x32xf32>
    %503 = arith.mulf %501, %502 : vector<8x32xf32>
    %504 = arith.addf %500, %503 : vector<8x32xf32>
    %505 = vector.extract_strided_slice %497 {offsets = [0, 96], sizes = [8, 32], strides = [1, 1]} : vector<8x128xf32> to vector<8x32xf32>
    %506 = math.tanh %504 : vector<8x32xf32>
    %507 = arith.mulf %505, %506 : vector<8x32xf32>
    %c13 = arith.constant 13 : index
    %c0_80 = arith.constant 0 : index
    %c0_81 = arith.constant 0 : index
    %508 = vector.load %arg1[%c13, %c0_80, %c0_81] : memref<16x8x128xf32, #tpu.memory_space<vmem>>, vector<1x8x128xf32>
    %509 = vector.shape_cast %508 : vector<1x8x128xf32> to vector<8x128xf32>
    %510 = arith.addf %509, %492 : vector<8x128xf32>
    %511 = arith.negf %510 : vector<8x128xf32>
    %512 = math.exp %511 : vector<8x128xf32>
    %cst_82 = arith.constant 1.000000e+00 : f32
    %513 = vector.broadcast %cst_82 : f32 to vector<8x128xf32>
    %514 = arith.addf %513, %512 : vector<8x128xf32>
    %515 = arith.divf %513, %514 : vector<8x128xf32>
    %516 = math.tanh %510 : vector<8x128xf32>
    %517 = vector.extract_strided_slice %515 {offsets = [0, 32], sizes = [8, 32], strides = [1, 1]} : vector<8x128xf32> to vector<8x32xf32>
    %518 = arith.mulf %517, %484 : vector<8x32xf32>
    %519 = vector.extract_strided_slice %515 {offsets = [0, 0], sizes = [8, 32], strides = [1, 1]} : vector<8x128xf32> to vector<8x32xf32>
    %520 = vector.extract_strided_slice %516 {offsets = [0, 64], sizes = [8, 32], strides = [1, 1]} : vector<8x128xf32> to vector<8x32xf32>
    %521 = arith.mulf %519, %520 : vector<8x32xf32>
    %522 = arith.addf %518, %521 : vector<8x32xf32>
    %523 = vector.extract_strided_slice %515 {offsets = [0, 96], sizes = [8, 32], strides = [1, 1]} : vector<8x128xf32> to vector<8x32xf32>
    %524 = math.tanh %522 : vector<8x32xf32>
    %525 = arith.mulf %523, %524 : vector<8x32xf32>
    %526 = tpu.concatenate %525, %507 in 1 : vector<8x32xf32>, vector<8x32xf32> -> vector<8x64xf32>
    %cst_83 = arith.constant dense<0.000000e+00> : vector<8x256xf32>
    %527 = tpu.matmul %526, %3, %cst_83 {dimension_numbers = #tpu.dot_dimension_numbers<[1], [0], [0], [1], [0, 0, 1, 1], [], []>} : vector<8x64xf32>, vector<64x256xf32>, vector<8x256xf32> -> vector<8x256xf32>
    %528 = vector.extract_strided_slice %527 {offsets = [0, 0], sizes = [8, 128], strides = [1, 1]} : vector<8x256xf32> to vector<8x128xf32>
    %529 = arith.addf %528, %6 : vector<8x128xf32>
    %530 = vector.extract_strided_slice %527 {offsets = [0, 128], sizes = [8, 128], strides = [1, 1]} : vector<8x256xf32> to vector<8x128xf32>
    %531 = arith.negf %529 : vector<8x128xf32>
    %532 = math.exp %531 : vector<8x128xf32>
    %cst_84 = arith.constant 1.000000e+00 : f32
    %533 = vector.broadcast %cst_84 : f32 to vector<8x128xf32>
    %534 = arith.addf %533, %532 : vector<8x128xf32>
    %535 = arith.divf %533, %534 : vector<8x128xf32>
    %536 = math.tanh %529 : vector<8x128xf32>
    %537 = vector.extract_strided_slice %535 {offsets = [0, 32], sizes = [8, 32], strides = [1, 1]} : vector<8x128xf32> to vector<8x32xf32>
    %538 = arith.mulf %537, %504 : vector<8x32xf32>
    %539 = vector.extract_strided_slice %535 {offsets = [0, 0], sizes = [8, 32], strides = [1, 1]} : vector<8x128xf32> to vector<8x32xf32>
    %540 = vector.extract_strided_slice %536 {offsets = [0, 64], sizes = [8, 32], strides = [1, 1]} : vector<8x128xf32> to vector<8x32xf32>
    %541 = arith.mulf %539, %540 : vector<8x32xf32>
    %542 = arith.addf %538, %541 : vector<8x32xf32>
    %543 = vector.extract_strided_slice %535 {offsets = [0, 96], sizes = [8, 32], strides = [1, 1]} : vector<8x128xf32> to vector<8x32xf32>
    %544 = math.tanh %542 : vector<8x32xf32>
    %545 = arith.mulf %543, %544 : vector<8x32xf32>
    %c14 = arith.constant 14 : index
    %c0_85 = arith.constant 0 : index
    %c0_86 = arith.constant 0 : index
    %546 = vector.load %arg1[%c14, %c0_85, %c0_86] : memref<16x8x128xf32, #tpu.memory_space<vmem>>, vector<1x8x128xf32>
    %547 = vector.shape_cast %546 : vector<1x8x128xf32> to vector<8x128xf32>
    %548 = arith.addf %547, %530 : vector<8x128xf32>
    %549 = arith.negf %548 : vector<8x128xf32>
    %550 = math.exp %549 : vector<8x128xf32>
    %cst_87 = arith.constant 1.000000e+00 : f32
    %551 = vector.broadcast %cst_87 : f32 to vector<8x128xf32>
    %552 = arith.addf %551, %550 : vector<8x128xf32>
    %553 = arith.divf %551, %552 : vector<8x128xf32>
    %554 = math.tanh %548 : vector<8x128xf32>
    %555 = vector.extract_strided_slice %553 {offsets = [0, 32], sizes = [8, 32], strides = [1, 1]} : vector<8x128xf32> to vector<8x32xf32>
    %556 = arith.mulf %555, %522 : vector<8x32xf32>
    %557 = vector.extract_strided_slice %553 {offsets = [0, 0], sizes = [8, 32], strides = [1, 1]} : vector<8x128xf32> to vector<8x32xf32>
    %558 = vector.extract_strided_slice %554 {offsets = [0, 64], sizes = [8, 32], strides = [1, 1]} : vector<8x128xf32> to vector<8x32xf32>
    %559 = arith.mulf %557, %558 : vector<8x32xf32>
    %560 = arith.addf %556, %559 : vector<8x32xf32>
    %561 = vector.extract_strided_slice %553 {offsets = [0, 96], sizes = [8, 32], strides = [1, 1]} : vector<8x128xf32> to vector<8x32xf32>
    %562 = math.tanh %560 : vector<8x32xf32>
    %563 = arith.mulf %561, %562 : vector<8x32xf32>
    %564 = tpu.concatenate %563, %545 in 1 : vector<8x32xf32>, vector<8x32xf32> -> vector<8x64xf32>
    %cst_88 = arith.constant dense<0.000000e+00> : vector<8x256xf32>
    %565 = tpu.matmul %564, %3, %cst_88 {dimension_numbers = #tpu.dot_dimension_numbers<[1], [0], [0], [1], [0, 0, 1, 1], [], []>} : vector<8x64xf32>, vector<64x256xf32>, vector<8x256xf32> -> vector<8x256xf32>
    %566 = vector.extract_strided_slice %565 {offsets = [0, 0], sizes = [8, 128], strides = [1, 1]} : vector<8x256xf32> to vector<8x128xf32>
    %567 = arith.addf %566, %6 : vector<8x128xf32>
    %568 = vector.extract_strided_slice %565 {offsets = [0, 128], sizes = [8, 128], strides = [1, 1]} : vector<8x256xf32> to vector<8x128xf32>
    %569 = arith.negf %567 : vector<8x128xf32>
    %570 = math.exp %569 : vector<8x128xf32>
    %cst_89 = arith.constant 1.000000e+00 : f32
    %571 = vector.broadcast %cst_89 : f32 to vector<8x128xf32>
    %572 = arith.addf %571, %570 : vector<8x128xf32>
    %573 = arith.divf %571, %572 : vector<8x128xf32>
    %574 = math.tanh %567 : vector<8x128xf32>
    %575 = vector.extract_strided_slice %573 {offsets = [0, 32], sizes = [8, 32], strides = [1, 1]} : vector<8x128xf32> to vector<8x32xf32>
    %576 = arith.mulf %575, %542 : vector<8x32xf32>
    %577 = vector.extract_strided_slice %573 {offsets = [0, 0], sizes = [8, 32], strides = [1, 1]} : vector<8x128xf32> to vector<8x32xf32>
    %578 = vector.extract_strided_slice %574 {offsets = [0, 64], sizes = [8, 32], strides = [1, 1]} : vector<8x128xf32> to vector<8x32xf32>
    %579 = arith.mulf %577, %578 : vector<8x32xf32>
    %580 = arith.addf %576, %579 : vector<8x32xf32>
    %581 = vector.extract_strided_slice %573 {offsets = [0, 96], sizes = [8, 32], strides = [1, 1]} : vector<8x128xf32> to vector<8x32xf32>
    %582 = math.tanh %580 : vector<8x32xf32>
    %583 = arith.mulf %581, %582 : vector<8x32xf32>
    %c15 = arith.constant 15 : index
    %c0_90 = arith.constant 0 : index
    %c0_91 = arith.constant 0 : index
    %584 = vector.load %arg1[%c15, %c0_90, %c0_91] : memref<16x8x128xf32, #tpu.memory_space<vmem>>, vector<1x8x128xf32>
    %585 = vector.shape_cast %584 : vector<1x8x128xf32> to vector<8x128xf32>
    %586 = arith.addf %585, %568 : vector<8x128xf32>
    %587 = arith.negf %586 : vector<8x128xf32>
    %588 = math.exp %587 : vector<8x128xf32>
    %cst_92 = arith.constant 1.000000e+00 : f32
    %589 = vector.broadcast %cst_92 : f32 to vector<8x128xf32>
    %590 = arith.addf %589, %588 : vector<8x128xf32>
    %591 = arith.divf %589, %590 : vector<8x128xf32>
    %592 = math.tanh %586 : vector<8x128xf32>
    %593 = vector.extract_strided_slice %591 {offsets = [0, 32], sizes = [8, 32], strides = [1, 1]} : vector<8x128xf32> to vector<8x32xf32>
    %594 = arith.mulf %593, %560 : vector<8x32xf32>
    %595 = vector.extract_strided_slice %591 {offsets = [0, 0], sizes = [8, 32], strides = [1, 1]} : vector<8x128xf32> to vector<8x32xf32>
    %596 = vector.extract_strided_slice %592 {offsets = [0, 64], sizes = [8, 32], strides = [1, 1]} : vector<8x128xf32> to vector<8x32xf32>
    %597 = arith.mulf %595, %596 : vector<8x32xf32>
    %598 = arith.addf %594, %597 : vector<8x32xf32>
    %599 = vector.extract_strided_slice %591 {offsets = [0, 96], sizes = [8, 32], strides = [1, 1]} : vector<8x128xf32> to vector<8x32xf32>
    %600 = math.tanh %598 : vector<8x32xf32>
    %601 = arith.mulf %599, %600 : vector<8x32xf32>
    %602 = tpu.concatenate %601, %583 in 1 : vector<8x32xf32>, vector<8x32xf32> -> vector<8x64xf32>
    %cst_93 = arith.constant dense<0.000000e+00> : vector<8x256xf32>
    %603 = tpu.matmul %602, %3, %cst_93 {dimension_numbers = #tpu.dot_dimension_numbers<[1], [0], [0], [1], [0, 0, 1, 1], [], []>} : vector<8x64xf32>, vector<64x256xf32>, vector<8x256xf32> -> vector<8x256xf32>
    %604 = vector.extract_strided_slice %603 {offsets = [0, 0], sizes = [8, 128], strides = [1, 1]} : vector<8x256xf32> to vector<8x128xf32>
    %605 = arith.addf %604, %6 : vector<8x128xf32>
    %606 = vector.extract_strided_slice %603 {offsets = [0, 128], sizes = [8, 128], strides = [1, 1]} : vector<8x256xf32> to vector<8x128xf32>
    %607 = arith.negf %605 : vector<8x128xf32>
    %608 = math.exp %607 : vector<8x128xf32>
    %cst_94 = arith.constant 1.000000e+00 : f32
    %609 = vector.broadcast %cst_94 : f32 to vector<8x128xf32>
    %610 = arith.addf %609, %608 : vector<8x128xf32>
    %611 = arith.divf %609, %610 : vector<8x128xf32>
    %612 = math.tanh %605 : vector<8x128xf32>
    %613 = vector.extract_strided_slice %611 {offsets = [0, 32], sizes = [8, 32], strides = [1, 1]} : vector<8x128xf32> to vector<8x32xf32>
    %614 = arith.mulf %613, %580 : vector<8x32xf32>
    %615 = vector.extract_strided_slice %611 {offsets = [0, 0], sizes = [8, 32], strides = [1, 1]} : vector<8x128xf32> to vector<8x32xf32>
    %616 = vector.extract_strided_slice %612 {offsets = [0, 64], sizes = [8, 32], strides = [1, 1]} : vector<8x128xf32> to vector<8x32xf32>
    %617 = arith.mulf %615, %616 : vector<8x32xf32>
    %618 = arith.addf %614, %617 : vector<8x32xf32>
    %619 = vector.extract_strided_slice %611 {offsets = [0, 96], sizes = [8, 32], strides = [1, 1]} : vector<8x128xf32> to vector<8x32xf32>
    %620 = math.tanh %618 : vector<8x32xf32>
    %621 = arith.mulf %619, %620 : vector<8x32xf32>
    %622 = tpu.concatenate %51, %89, %127, %165, %203, %241, %279, %317, %355, %393, %431, %469, %507, %545, %583, %621 in 1 : vector<8x32xf32>, vector<8x32xf32>, vector<8x32xf32>, vector<8x32xf32>, vector<8x32xf32>, vector<8x32xf32>, vector<8x32xf32>, vector<8x32xf32>, vector<8x32xf32>, vector<8x32xf32>, vector<8x32xf32>, vector<8x32xf32>, vector<8x32xf32>, vector<8x32xf32>, vector<8x32xf32>, vector<8x32xf32> -> vector<8x512xf32>
    %623 = vector.shape_cast %622 : vector<8x512xf32> to vector<1x8x512xf32>
    %c0_95 = arith.constant 0 : index
    %c0_96 = arith.constant 0 : index
    %c0_97 = arith.constant 0 : index
    %624 = vector.load %arg4[%c0_95, %c0_96, %c0_97] : memref<1x8x512xf32, #tpu.memory_space<vmem>>, vector<1x8x512xf32>
    tpu.vector_store %arg4[%c0_95, %c0_96, %c0_97], %623 {strides = array<i32>} : memref<1x8x512xf32, #tpu.memory_space<vmem>>, vector<1x8x512xf32>,
    %c0_98 = arith.constant 0 : index
    %c0_99 = arith.constant 0 : index
    %c0_100 = arith.constant 0 : index
    %625 = vector.load %arg5[%c0_98, %c0_99, %c0_100] : memref<3x8x32xf32, #tpu.memory_space<vmem>>, vector<1x8x32xf32>
    %626 = vector.shape_cast %625 : vector<1x8x32xf32> to vector<8x32xf32>
    %627 = vector.shape_cast %598 : vector<8x32xf32> to vector<1x8x32xf32>
    tpu.vector_store %arg5[%c0_98, %c0_99, %c0_100], %627 {strides = array<i32>} : memref<3x8x32xf32, #tpu.memory_space<vmem>>, vector<1x8x32xf32>,
    %c1_101 = arith.constant 1 : index
    %c0_102 = arith.constant 0 : index
    %c0_103 = arith.constant 0 : index
    %628 = vector.load %arg5[%c1_101, %c0_102, %c0_103] : memref<3x8x32xf32, #tpu.memory_space<vmem>>, vector<1x8x32xf32>
    %629 = vector.shape_cast %628 : vector<1x8x32xf32> to vector<8x32xf32>
    %630 = vector.shape_cast %618 : vector<8x32xf32> to vector<1x8x32xf32>
    tpu.vector_store %arg5[%c1_101, %c0_102, %c0_103], %630 {strides = array<i32>} : memref<3x8x32xf32, #tpu.memory_space<vmem>>, vector<1x8x32xf32>,
    %c2_104 = arith.constant 2 : index
    %c0_105 = arith.constant 0 : index
    %c0_106 = arith.constant 0 : index
    %631 = vector.load %arg5[%c2_104, %c0_105, %c0_106] : memref<3x8x32xf32, #tpu.memory_space<vmem>>, vector<1x8x32xf32>
    %632 = vector.shape_cast %631 : vector<1x8x32xf32> to vector<8x32xf32>
    %633 = vector.shape_cast %621 : vector<8x32xf32> to vector<1x8x32xf32>
    tpu.vector_store %arg5[%c2_104, %c0_105, %c0_106], %633 {strides = array<i32>} : memref<3x8x32xf32, #tpu.memory_space<vmem>>, vector<1x8x32xf32>,
    %c0_107 = arith.constant 0 : index
    %c0_108 = arith.constant 0 : index
    %634 = vector.load %arg6[%c0_107, %c0_108] : memref<8x128xf32, #tpu.memory_space<vmem>>, vector<8x128xf32>
    tpu.vector_store %arg6[%c0_107, %c0_108], %606 {strides = array<i32>} : memref<8x128xf32, #tpu.memory_space<vmem>>, vector<8x128xf32>,
    return
  }
  func.func @transform_0(%arg0: i32) -> (i32, i32, i32) {
    %c0_i32 = arith.constant 0 : i32
    %c0_i32_0 = arith.constant 0 : i32
    %c0_i32_1 = arith.constant 0 : i32
    return %arg0, %c0_i32, %c0_i32_0 : i32, i32, i32
  }
  func.func @transform_1(%arg0: i32) -> (i32, i32) {
    %c0_i32 = arith.constant 0 : i32
    %c0_i32_0 = arith.constant 0 : i32
    %c0_i32_1 = arith.constant 0 : i32
    return %c0_i32, %c0_i32_0 : i32, i32
  }
  func.func @transform_2(%arg0: i32) -> (i32, i32) {
    %c0_i32 = arith.constant 0 : i32
    %c0_i32_0 = arith.constant 0 : i32
    %c0_i32_1 = arith.constant 0 : i32
    return %c0_i32, %c0_i32_0 : i32, i32
  }
  func.func @transform_3(%arg0: i32) -> (i32, i32, i32) {
    %c0_i32 = arith.constant 0 : i32
    %c0_i32_0 = arith.constant 0 : i32
    %c0_i32_1 = arith.constant 0 : i32
    return %arg0, %c0_i32, %c0_i32_0 : i32, i32, i32
  }
}

</mosaic_0001>

<bundles_post_ra>
// kernel: lstm_forward.1
= control target key start
LH: loop header
LB: loop body
LE: loop exit
PB: predicated region body
PF: predicated region fallthrough
CT: control target
= control target key end

     0   :  { %vm18_vm0 = vcmask 261120   ;;  %v2863_v1 = vmov 0.0   ;;  %s2864_s14 = smov 64   ;;  %s2865_s15 = smov 32   ;;  %vm92_vm1 = vcmask 523264   ;;  %vm2247_vm2 = vcmask 785408   ;;  %s3429_s0 = inlined_call_operand.vmem [shape: f32[16,8,128], index: 0, kind: input, shape index: {}]   ;;  %s3430_s1 = inlined_call_operand.vmem [shape: f32[64,256], index: 1, kind: input, shape index: {}]   ;;  %s3431_s2 = inlined_call_operand.vmem [shape: f32[1,128], index: 2, kind: input, shape index: {}]   ;;  %s3432_s3 = inlined_call_operand.vmem [shape: f32[1,8,512], index: 3, kind: output, shape index: {}]  }
   0x1   :  { %v52_v0 = vld [vmem:[%s3429_s0] sm:$0xff]  ;;  %19 = vst.msk [vmem:[#allocation2] sm:$0xff] %vm18_vm0, %v2863_v1  ;;  %20 = vst.msk [vmem:[#allocation2 + $0x8] sm:$0xff] %vm18_vm0, %v2863_v1  ;;  %160 = vmatprep.mubr.f32.mxu0 %v2863_v1  ;;  %299 = vmatprep.mubr.f32.mxu1 %v2863_v1  ;;  %v24_v14 = vld [vmem:[%s3430_s1 + $0x8] sm:$0xff] }
   0x2   :  { %21 = vst.msk [vmem:[#allocation2 + $0x10] sm:$0xff] %vm18_vm0, %v2863_v1  ;;  %2606 = vtanh.f32 %v52_v0  ;;  %v2283_v4 = vmul.f32 -1.442695, %v52_v0  ;;  %v26_v15 = vld [vmem:[%s3430_s1 + $0x18] sm:$0xff]  ;;  %v23_v16 = vld [vmem:[%s3430_s1] sm:$0xff]  ;;  %v25_v18 = vld [vmem:[%s3430_s1 + $0x10] sm:$0xff] }
   0x3   :  { %v2913_v17 = vpack.c.bf16 %v26_v15, %v24_v14  ;;  %v28_v19 = vld [vmem:[%s3430_s1 + $0x28] sm:$0xff]  ;;  %v30_v20 = vld [vmem:[%s3430_s1 + $0x38] sm:$0xff]  ;;  %v2924_v21 = vpack.c.bf16 %v25_v18, %v23_v16  ;;  %v27_v23 = vld [vmem:[%s3430_s1 + $0x20] sm:$0xff] }
   0x4   :  { %2608 = vpow2.f32 %v2283_v4  ;;  %v2926_v22 = vpack.c.bf16 %v30_v20, %v28_v19  ;;  %v29_v24 = vld [vmem:[%s3430_s1 + $0x30] sm:$0xff]  ;;  %v32_v25 = vld [vmem:[%s3430_s1 + $0x48] sm:$0xff]  ;;  %v34_v26 = vld [vmem:[%s3430_s1 + $0x58] sm:$0xff] }
   0x5   :  { %2347 = vmatprep.subr.bf16.mxu0 %v2913_v17  ;;  %2363 = vmatprep.subr.bf16.mxu1 %v2913_v17  ;;  %v2943_v27 = vpack.c.bf16 %v29_v24, %v27_v23  ;;  %v2947_v28 = vpack.c.bf16 %v34_v26, %v32_v25  ;;  %v31_v29 = vld [vmem:[%s3430_s1 + $0x40] sm:$0xff]  ;;  %v33_v30 = vld [vmem:[%s3430_s1 + $0x50] sm:$0xff]  ;;  %v36_v31 = vld [vmem:[%s3430_s1 + $0x68] sm:$0xff] }
   0x6   :  { %2349 = vmatpush1.bf16.msra.mxu0 %v2924_v21  ;;  %2365 = vmatpush1.bf16.msra.mxu1 %v2924_v21  ;;  %v38_v32 = vld [vmem:[%s3430_s1 + $0x78] sm:$0xff]  ;;  %v2963_v33 = vpack.c.bf16 %v33_v30, %v31_v29  ;;  %v35_v36 = vld [vmem:[%s3430_s1 + $0x60] sm:$0xff]  ;;  %v37_v37 = vld [vmem:[%s3430_s1 + $0x70] sm:$0xff] }
   0x7   :  { %2351 = vmatprep.subr.bf16.mxu0 %v2926_v22  ;;  %2367 = vmatprep.subr.bf16.mxu1 %v2926_v22  ;;  %v2967_v35 = vpack.c.bf16 %v38_v32, %v36_v31  ;;  %v2978_v39 = vpack.c.bf16 %v37_v37, %v35_v36  ;;  %v3003_v45 = vld [vmem:[%s3431_s2] ss:$0 sm:$0xff]  ;;  %v2286_v46 = vld [vmem:[%s3429_s0 + $0x8] sm:$0xff]  ;;  %v2290_v20 = vld [vmem:[%s3429_s0 + $0x10] sm:$0xff] }
   0x8   :  { %v46_v3 = vld [vmem:[#allocation2] sm:$0xff]  ;;  %v48_v53 = vld [vmem:[#allocation2 + $0x8] sm:$0xff] }
   0x9   :  { %v50_v38 = vld [vmem:[#allocation2 + $0x10] sm:$0xff] }
   0xa   :  { %2353 = vmatpush1.bf16.msra.mxu0 %v2943_v27  ;;  %2369 = vmatpush1.bf16.msra.mxu1 %v2943_v27 }
   0xb   :  { %2355 = vmatprep.subr.bf16.mxu0 %v2947_v28  ;;  %2371 = vmatprep.subr.bf16.mxu1 %v2947_v28 }
   0xc   :  { %v2607_v2 = vpop.eup %2606 }
   0xd   :  { %67 = vrot.lane.b32.xlu0 %v2607_v2, %s2864_s14 }
   0xe   :  { %v2609_v5 = vpop.eup %2608  ;;  %2357 = vmatpush1.bf16.msra.mxu0 %v2963_v33  ;;  %2373 = vmatpush1.bf16.msra.mxu1 %v2963_v33 }
   0xf   :  { %v57_v6 = vadd.f32 1.0, %v2609_v5  ;;  %2359 = vmatprep.subr.bf16.mxu0 %v2967_v35  ;;  %2375 = vmatprep.subr.bf16.mxu1 %v2967_v35 }
  0x11   :  { %62 = vrot.lane.b32.xlu0 %v46_v3, %s2865_s15  ;;  %2610 = vrcp.f32 %v57_v6 }
  0x12   :  { %2361 = vmatpush1.bf16.msra.mxu0 %v2978_v39  ;;  %2377 = vmatpush1.bf16.msra.mxu1 %v2978_v39 }
  0x13   :  { %2379 = vmatprep.subr.bf16.mxu0 %v2913_v17  ;;  %2395 = vmatprep.subr.bf16.mxu1 %v2913_v17 }
  0x1b   :  { %v2611_v7 = vpop.eup %2610 }
  0x7f   :  { %v68_v8 = vpop.permute.xlu0 %67 }
  0x80   :  { %v70_v9 = vmul.f32 %v2611_v7, %v68_v8 }
  0x82   :  { %72 = vrot.lane.b32.xlu1 %v70_v9, %s2865_s15 }
  0x83   :  { %v63_v10 = vpop.permute.xlu0 %62 }
  0x84   :  { %v65_v11 = vmul.f32 %v2611_v7, %v63_v10 }
  0xf4   :  { %v73_v12 = vpop.permute.xlu1 %72 }
  0xf5   :  { %v2901_v13 = vadd.f32 %v73_v12, %v65_v11 }
  0xf7   :  { %2612 = vtanh.f32 %v2901_v13 }
 0x101   :  { %v2613_v34 = vpop.eup %2612 }
 0x102   :  { %78 = vrot.lane.b32.xlu1 %v2613_v34, %s2864_s14 }
 0x106   :  { %87 = vrot.lane.b32.xlu1 %v50_v38, %s2865_s15 }
 0x174   :  { %v79_v40 = vpop.permute.xlu1 %78 }
 0x175   :  { %v81_v41 = vmul.f32 %v2611_v7, %v79_v40 }
 0x177   :  { %83 = vrot.lane.b32.xlu0 %v81_v41, %s2865_s15 }
 0x178   :  { %v88_v42 = vpop.permute.xlu1 %87 }
 0x1e9   :  { %v84_v43 = vpop.permute.xlu0 %83 }
 0x1ea   :  { %v91_v44 = vsel %vm18_vm0, %v84_v43, %v88_v42 }
 0x1eb   :  { %2284 = vmatmul.mubr.msk.f32.vlgmr.msra.gmra.mrb[0].mxu0 %vm92_vm1, %v91_v44 }
 0x1ec   :  { %2381 = vmatpush1.bf16.msra.mxu0 %v2924_v21  ;;  %434 = vmatprep.mubr.f32.mxu0 %v2863_v1 }
 0x1ed   :  { %2383 = vmatprep.subr.bf16.mxu0 %v2926_v22 }
 0x1f0   :  { %2385 = vmatpush1.bf16.msra.mxu0 %v2943_v27 }
 0x1f1   :  { %2387 = vmatprep.subr.bf16.mxu0 %v2947_v28 }
 0x1f4   :  { %2389 = vmatpush1.bf16.msra.mxu0 %v2963_v33 }
 0x1f5   :  { %2391 = vmatprep.subr.bf16.mxu0 %v2967_v35 }
 0x1f8   :  { %2393 = vmatpush1.bf16.msra.mxu0 %v2978_v39 }
 0x1f9   :  { %2411 = vmatprep.subr.bf16.mxu0 %v2913_v17 }
 0x2be   :  { %v162_v47 = vpop.f32.mrb[0].mxu0 }
 0x2bf   :  { %v167_v48 = vadd.f32 %v3003_v45, %v162_v47  ;;  %v164_v49 = vpop.f32.mrb[1].mxu0 }
 0x2c0   :  { %v198_v50 = vadd.f32 %v2286_v46, %v164_v49 }
 0x2c1   :  { %2614 = vtanh.f32 %v167_v48  ;;  %v2285_v54 = vmul.f32 -1.442695, %v167_v48 }
 0x2c2   :  { %2616 = vtanh.f32 %v198_v50  ;;  %v2287_v55 = vmul.f32 -1.442695, %v198_v50 }
 0x2c3   :  { %2618 = vpow2.f32 %v2285_v54 }
 0x2c4   :  { %2620 = vpow2.f32 %v2287_v55 }
 0x2cb   :  { %v2615_v51 = vpop.eup %2614 }
 0x2cc   :  { %v2617_v52 = vpop.eup %2616  ;;  %181 = vrot.lane.b32.xlu0 %v2615_v51, %s2864_s14 }
 0x2cd   :  { %208 = vrot.lane.b32.xlu1 %v2617_v52, %s2864_s14  ;;  %v2619_v56 = vpop.eup %2618 }
 0x2ce   :  { %v2621_v57 = vpop.eup %2620  ;;  %v171_v58 = vadd.f32 1.0, %v2619_v56 }
 0x2cf   :  { %v202_v59 = vadd.f32 1.0, %v2621_v57 }
 0x2d0   :  { %176 = vrot.lane.b32.xlu0 %v48_v53, %s2865_s15  ;;  %2622 = vrcp.f32 %v171_v58 }
 0x2d1   :  { %2624 = vrcp.f32 %v202_v59 }
 0x2da   :  { %v2623_v60 = vpop.eup %2622 }
 0x2db   :  { %v2625_v62 = vpop.eup %2624 }
 0x2dc   :  { %v206_v6 = vmul.f32 %v2625_v62, %v2901_v13 }
 0x33e   :  { %v182_v61 = vpop.permute.xlu0 %181 }
 0x33f   :  { %v184_v63 = vmul.f32 %v2623_v60, %v182_v61  ;;  %v209_v0 = vpop.permute.xlu1 %208 }
 0x340   :  { %v211_v2 = vmul.f32 %v2625_v62, %v209_v0 }
 0x341   :  { %186 = vrot.lane.b32.xlu1 %v184_v63, %s2865_s15 }
 0x342   :  { %213 = vrot.lane.b32.xlu0 %v211_v2, %s2865_s15  ;;  %v177_v3 = vpop.permute.xlu0 %176 }
 0x343   :  { %v179_v4 = vmul.f32 %v2623_v60, %v177_v3 }
 0x3b3   :  { %v187_v5 = vpop.permute.xlu1 %186 }
 0x3b4   :  { %v189_v7 = vadd.f32 %v187_v5, %v179_v4  ;;  %v214_v8 = vpop.permute.xlu0 %213 }
 0x3b5   :  { %v216_v9 = vadd.f32 %v214_v8, %v206_v6 }
 0x3b6   :  { %2626 = vtanh.f32 %v189_v7 }
 0x3b7   :  { %2628 = vtanh.f32 %v216_v9 }
 0x3c0   :  { %v2627_v10 = vpop.eup %2626 }
 0x3c1   :  { %v2629_v11 = vpop.eup %2628  ;;  %192 = vrot.lane.b32.xlu1 %v2627_v10, %s2864_s14 }
 0x3c2   :  { %219 = vrot.lane.b32.xlu0 %v2629_v11, %s2864_s14 }
 0x433   :  { %v193_v12 = vpop.permute.xlu1 %192 }
 0x434   :  { %v3017_v14 = vmul.f32 %v2623_v60, %v193_v12  ;;  %v220_v15 = vpop.permute.xlu0 %219 }
 0x435   :  { %v222_v16 = vmul.f32 %v2625_v62, %v220_v15  ;;  %v2294_v62 = vld [vmem:[%s3429_s0 + $0x18] sm:$0xff] }
 0x436   :  { %228 = vrot.lane.b32.xlu0 %v3017_v14, %s2864_s14 }
 0x437   :  { %224 = vrot.lane.b32.xlu1 %v222_v16, %s2865_s15 }
 0x4a8   :  { %v229_v13 = vpop.permute.xlu0 %228 }
 0x4a9   :  { %v225_v18 = vpop.permute.xlu1 %224 }
 0x4aa   :  { %v231_v19 = vsel %vm18_vm0, %v225_v18, %v229_v13 }
 0x4ab   :  { %2288 = vmatmul.mubr.msk.f32.vlgmr.msra.gmra.mrb[0].mxu1 %vm92_vm1, %v231_v19 }
 0x4ac   :  { %2397 = vmatpush1.bf16.msra.mxu1 %v2924_v21  ;;  %569 = vmatprep.mubr.f32.mxu1 %v2863_v1 }
 0x4ad   :  { %2399 = vmatprep.subr.bf16.mxu1 %v2926_v22 }
 0x4b0   :  { %2401 = vmatpush1.bf16.msra.mxu1 %v2943_v27 }
 0x4b1   :  { %2403 = vmatprep.subr.bf16.mxu1 %v2947_v28 }
 0x4b4   :  { %2405 = vmatpush1.bf16.msra.mxu1 %v2963_v33 }
 0x4b5   :  { %2407 = vmatprep.subr.bf16.mxu1 %v2967_v35 }
 0x4b8   :  { %2409 = vmatpush1.bf16.msra.mxu1 %v2978_v39 }
 0x4b9   :  { %2427 = vmatprep.subr.bf16.mxu1 %v2913_v17 }
 0x57e   :  { %v301_v23 = vpop.f32.mrb[0].mxu1 }
 0x57f   :  { %v306_v24 = vadd.f32 %v3003_v45, %v301_v23  ;;  %v303_v25 = vpop.f32.mrb[1].mxu1 }
 0x580   :  { %v333_v26 = vadd.f32 %v2290_v20, %v303_v25 }
 0x581   :  { %2630 = vtanh.f32 %v306_v24  ;;  %v2289_v31 = vmul.f32 -1.442695, %v306_v24 }
 0x582   :  { %2632 = vtanh.f32 %v333_v26  ;;  %v2291_v32 = vmul.f32 -1.442695, %v333_v26 }
 0x583   :  { %2634 = vpow2.f32 %v2289_v31 }
 0x584   :  { %2636 = vpow2.f32 %v2291_v32 }
 0x58b   :  { %v2631_v29 = vpop.eup %2630 }
 0x58c   :  { %v2633_v30 = vpop.eup %2632  ;;  %316 = vrot.lane.b32.xlu1 %v2631_v29, %s2864_s14 }
 0x58d   :  { %343 = vrot.lane.b32.xlu0 %v2633_v30, %s2864_s14  ;;  %v2635_v34 = vpop.eup %2634 }
 0x58e   :  { %v2637_v36 = vpop.eup %2636  ;;  %v310_v37 = vadd.f32 1.0, %v2635_v34 }
 0x58f   :  { %v337_v38 = vadd.f32 1.0, %v2637_v36 }
 0x590   :  { %2638 = vrcp.f32 %v310_v37 }
 0x591   :  { %2640 = vrcp.f32 %v337_v38 }
 0x59a   :  { %v2639_v40 = vpop.eup %2638 }
 0x59b   :  { %v2641_v42 = vpop.eup %2640  ;;  %v314_v47 = vmul.f32 %v2639_v40, %v189_v7 }
 0x59c   :  { %v341_v49 = vmul.f32 %v2641_v42, %v216_v9 }
 0x5fe   :  { %v317_v41 = vpop.permute.xlu1 %316 }
 0x5ff   :  { %v319_v43 = vmul.f32 %v2639_v40, %v317_v41  ;;  %v344_v44 = vpop.permute.xlu0 %343 }
 0x600   :  { %v346_v46 = vmul.f32 %v2641_v42, %v344_v44 }
 0x601   :  { %321 = vrot.lane.b32.xlu1 %v319_v43, %s2865_s15 }
 0x602   :  { %348 = vrot.lane.b32.xlu0 %v346_v46, %s2865_s15 }
 0x673   :  { %v322_v48 = vpop.permute.xlu1 %321 }
 0x674   :  { %v324_v50 = vadd.f32 %v322_v48, %v314_v47  ;;  %v349_v51 = vpop.permute.xlu0 %348 }
 0x675   :  { %v351_v52 = vadd.f32 %v349_v51, %v341_v49 }
 0x676   :  { %2642 = vtanh.f32 %v324_v50 }
 0x677   :  { %2644 = vtanh.f32 %v351_v52 }
 0x680   :  { %v2643_v53 = vpop.eup %2642 }
 0x681   :  { %v2645_v54 = vpop.eup %2644  ;;  %327 = vrot.lane.b32.xlu1 %v2643_v53, %s2864_s14 }
 0x682   :  { %354 = vrot.lane.b32.xlu0 %v2645_v54, %s2864_s14 }
 0x6f3   :  { %v328_v55 = vpop.permute.xlu1 %327 }
 0x6f4   :  { %v330_v56 = vmul.f32 %v2639_v40, %v328_v55  ;;  %v355_v57 = vpop.permute.xlu0 %354 }
 0x6f5   :  { %v357_v58 = vmul.f32 %v2641_v42, %v355_v57  ;;  %v2298_v42 = vld [vmem:[%s3429_s0 + $0x20] sm:$0xff] }
 0x6f6   :  { %363 = vrot.lane.b32.xlu0 %v330_v56, %s2864_s14 }
 0x6f7   :  { %359 = vrot.lane.b32.xlu1 %v357_v58, %s2865_s15 }
 0x768   :  { %v3045_v59 = vpop.permute.xlu0 %363 }
 0x769   :  { %v360_v60 = vpop.permute.xlu1 %359 }
 0x76a   :  { %v366_v61 = vsel %vm18_vm0, %v360_v60, %v3045_v59 }
 0x76b   :  { %2292 = vmatmul.mubr.msk.f32.vlgmr.msra.gmra.mrb[2].mxu0 %vm92_vm1, %v366_v61 }
 0x76c   :  { %2413 = vmatpush1.bf16.msra.mxu0 %v2924_v21  ;;  %704 = vmatprep.mubr.f32.mxu0 %v2863_v1 }
 0x76d   :  { %2415 = vmatprep.subr.bf16.mxu0 %v2926_v22 }
 0x770   :  { %2417 = vmatpush1.bf16.msra.mxu0 %v2943_v27 }
 0x771   :  { %2419 = vmatprep.subr.bf16.mxu0 %v2947_v28 }
 0x774   :  { %2421 = vmatpush1.bf16.msra.mxu0 %v2963_v33 }
 0x775   :  { %2423 = vmatprep.subr.bf16.mxu0 %v2967_v35 }
 0x778   :  { %2425 = vmatpush1.bf16.msra.mxu0 %v2978_v39 }
 0x779   :  { %2443 = vmatprep.subr.bf16.mxu0 %v2913_v17 }
 0x83e   :  { %v436_v63 = vpop.f32.mrb[2].mxu0 }
 0x83f   :  { %v441_v0 = vadd.f32 %v3003_v45, %v436_v63  ;;  %v438_v2 = vpop.f32.mrb[3].mxu0 }
 0x840   :  { %v468_v3 = vadd.f32 %v2294_v62, %v438_v2 }
 0x841   :  { %2646 = vtanh.f32 %v441_v0  ;;  %v2293_v6 = vmul.f32 -1.442695, %v441_v0 }
 0x842   :  { %2648 = vtanh.f32 %v468_v3  ;;  %v2295_v7 = vmul.f32 -1.442695, %v468_v3 }
 0x843   :  { %2650 = vpow2.f32 %v2293_v6 }
 0x844   :  { %2652 = vpow2.f32 %v2295_v7 }
 0x84b   :  { %v2647_v4 = vpop.eup %2646 }
 0x84c   :  { %v2649_v5 = vpop.eup %2648  ;;  %451 = vrot.lane.b32.xlu1 %v2647_v4, %s2864_s14 }
 0x84d   :  { %478 = vrot.lane.b32.xlu0 %v2649_v5, %s2864_s14  ;;  %v2651_v8 = vpop.eup %2650 }
 0x84e   :  { %v2653_v9 = vpop.eup %2652  ;;  %v445_v10 = vadd.f32 1.0, %v2651_v8 }
 0x84f   :  { %v472_v11 = vadd.f32 1.0, %v2653_v9 }
 0x850   :  { %2654 = vrcp.f32 %v445_v10 }
 0x851   :  { %2656 = vrcp.f32 %v472_v11 }
 0x85a   :  { %v2655_v12 = vpop.eup %2654 }
 0x85b   :  { %v2657_v16 = vpop.eup %2656  ;;  %v449_v20 = vmul.f32 %v2655_v12, %v324_v50 }
 0x85c   :  { %v476_v24 = vmul.f32 %v2657_v16, %v351_v52 }
 0x8be   :  { %v452_v15 = vpop.permute.xlu1 %451 }
 0x8bf   :  { %v454_v13 = vmul.f32 %v2655_v12, %v452_v15  ;;  %v479_v18 = vpop.permute.xlu0 %478 }
 0x8c0   :  { %v481_v19 = vmul.f32 %v2657_v16, %v479_v18 }
 0x8c1   :  { %456 = vrot.lane.b32.xlu1 %v454_v13, %s2865_s15  ;;  %v2302_v13 = vld [vmem:[%s3429_s0 + $0x28] sm:$0xff] }
 0x8c2   :  { %483 = vrot.lane.b32.xlu0 %v481_v19, %s2865_s15 }
 0x933   :  { %v457_v23 = vpop.permute.xlu1 %456 }
 0x934   :  { %v459_v25 = vadd.f32 %v457_v23, %v449_v20  ;;  %v484_v26 = vpop.permute.xlu0 %483 }
 0x935   :  { %v486_v29 = vadd.f32 %v484_v26, %v476_v24 }
 0x936   :  { %2658 = vtanh.f32 %v459_v25 }
 0x937   :  { %2660 = vtanh.f32 %v486_v29 }
 0x940   :  { %v2659_v30 = vpop.eup %2658 }
 0x941   :  { %v2661_v31 = vpop.eup %2660  ;;  %462 = vrot.lane.b32.xlu1 %v2659_v30, %s2864_s14 }
 0x942   :  { %489 = vrot.lane.b32.xlu0 %v2661_v31, %s2864_s14 }
 0x9b3   :  { %v463_v32 = vpop.permute.xlu1 %462 }
 0x9b4   :  { %v3069_v34 = vmul.f32 %v2655_v12, %v463_v32  ;;  %v490_v36 = vpop.permute.xlu0 %489 }
 0x9b5   :  { %v492_v37 = vmul.f32 %v2657_v16, %v490_v36 }
 0x9b6   :  { %498 = vrot.lane.b32.xlu0 %v3069_v34, %s2864_s14 }
 0x9b7   :  { %494 = vrot.lane.b32.xlu1 %v492_v37, %s2865_s15 }
 0xa28   :  { %v499_v38 = vpop.permute.xlu0 %498 }
 0xa29   :  { %v495_v40 = vpop.permute.xlu1 %494 }
 0xa2a   :  { %v501_v41 = vsel %vm18_vm0, %v495_v40, %v499_v38 }
 0xa2b   :  { %2296 = vmatmul.mubr.msk.f32.vlgmr.msra.gmra.mrb[2].mxu1 %vm92_vm1, %v501_v41 }
 0xa2c   :  { %2429 = vmatpush1.bf16.msra.mxu1 %v2924_v21  ;;  %839 = vmatprep.mubr.f32.mxu1 %v2863_v1 }
 0xa2d   :  { %2431 = vmatprep.subr.bf16.mxu1 %v2926_v22 }
 0xa30   :  { %2433 = vmatpush1.bf16.msra.mxu1 %v2943_v27 }
 0xa31   :  { %2435 = vmatprep.subr.bf16.mxu1 %v2947_v28 }
 0xa34   :  { %2437 = vmatpush1.bf16.msra.mxu1 %v2963_v33 }
 0xa35   :  { %2439 = vmatprep.subr.bf16.mxu1 %v2967_v35 }
 0xa38   :  { %2441 = vmatpush1.bf16.msra.mxu1 %v2978_v39 }
 0xa39   :  { %2459 = vmatprep.subr.bf16.mxu1 %v2913_v17 }
 0xafe   :  { %v571_v43 = vpop.f32.mrb[2].mxu1 }
 0xaff   :  { %v576_v44 = vadd.f32 %v3003_v45, %v571_v43  ;;  %v573_v46 = vpop.f32.mrb[3].mxu1 }
 0xb00   :  { %v603_v47 = vadd.f32 %v2298_v42, %v573_v46 }
 0xb01   :  { %2662 = vtanh.f32 %v576_v44  ;;  %v2297_v50 = vmul.f32 -1.442695, %v576_v44 }
 0xb02   :  { %2664 = vtanh.f32 %v603_v47  ;;  %v2299_v51 = vmul.f32 -1.442695, %v603_v47 }
 0xb03   :  { %2666 = vpow2.f32 %v2297_v50 }
 0xb04   :  { %2668 = vpow2.f32 %v2299_v51 }
 0xb0b   :  { %v2663_v48 = vpop.eup %2662 }
 0xb0c   :  { %v2665_v49 = vpop.eup %2664  ;;  %586 = vrot.lane.b32.xlu1 %v2663_v48, %s2864_s14 }
 0xb0d   :  { %613 = vrot.lane.b32.xlu0 %v2665_v49, %s2864_s14  ;;  %v2667_v52 = vpop.eup %2666 }
 0xb0e   :  { %v2669_v53 = vpop.eup %2668  ;;  %v580_v54 = vadd.f32 1.0, %v2667_v52 }
 0xb0f   :  { %v607_v55 = vadd.f32 1.0, %v2669_v53 }
 0xb10   :  { %2670 = vrcp.f32 %v580_v54 }
 0xb11   :  { %2672 = vrcp.f32 %v607_v55 }
 0xb1a   :  { %v2671_v56 = vpop.eup %2670 }
 0xb1b   :  { %v2673_v58 = vpop.eup %2672  ;;  %v584_v63 = vmul.f32 %v2671_v56, %v459_v25 }
 0xb1c   :  { %v611_v2 = vmul.f32 %v2673_v58, %v486_v29 }
 0xb7e   :  { %v587_v57 = vpop.permute.xlu1 %586 }
 0xb7f   :  { %v589_v60 = vmul.f32 %v2671_v56, %v587_v57  ;;  %v614_v61 = vpop.permute.xlu0 %613 }
 0xb80   :  { %v616_v62 = vmul.f32 %v2673_v58, %v614_v61  ;;  %v2306_v61 = vld [vmem:[%s3429_s0 + $0x30] sm:$0xff] }
 0xb81   :  { %591 = vrot.lane.b32.xlu1 %v589_v60, %s2865_s15 }
 0xb82   :  { %618 = vrot.lane.b32.xlu0 %v616_v62, %s2865_s15 }
 0xbf3   :  { %v592_v0 = vpop.permute.xlu1 %591 }
 0xbf4   :  { %v594_v3 = vadd.f32 %v592_v0, %v584_v63  ;;  %v619_v4 = vpop.permute.xlu0 %618 }
 0xbf5   :  { %v621_v5 = vadd.f32 %v619_v4, %v611_v2 }
 0xbf6   :  { %2674 = vtanh.f32 %v594_v3 }
 0xbf7   :  { %2676 = vtanh.f32 %v621_v5 }
 0xc00   :  { %v2675_v6 = vpop.eup %2674 }
 0xc01   :  { %v2677_v7 = vpop.eup %2676  ;;  %597 = vrot.lane.b32.xlu1 %v2675_v6, %s2864_s14 }
 0xc02   :  { %624 = vrot.lane.b32.xlu0 %v2677_v7, %s2864_s14 }
 0xc73   :  { %v598_v8 = vpop.permute.xlu1 %597 }
 0xc74   :  { %v3095_v9 = vmul.f32 %v2671_v56, %v598_v8  ;;  %v625_v10 = vpop.permute.xlu0 %624 }
 0xc75   :  { %v627_v11 = vmul.f32 %v2673_v58, %v625_v10 }
 0xc76   :  { %633 = vrot.lane.b32.xlu0 %v3095_v9, %s2864_s14 }
 0xc77   :  { %629 = vrot.lane.b32.xlu1 %v627_v11, %s2865_s15 }
 0xce8   :  { %v634_v12 = vpop.permute.xlu0 %633 }
 0xce9   :  { %v630_v15 = vpop.permute.xlu1 %629 }
 0xcea   :  { %v636_v16 = vsel %vm18_vm0, %v630_v15, %v634_v12 }
 0xceb   :  { %2300 = vmatmul.mubr.msk.f32.vlgmr.msra.gmra.mrb[4].mxu0 %vm92_vm1, %v636_v16 }
 0xcec   :  { %2445 = vmatpush1.bf16.msra.mxu0 %v2924_v21  ;;  %974 = vmatprep.mubr.f32.mxu0 %v2863_v1 }
 0xced   :  { %2447 = vmatprep.subr.bf16.mxu0 %v2926_v22 }
 0xcf0   :  { %2449 = vmatpush1.bf16.msra.mxu0 %v2943_v27 }
 0xcf1   :  { %2451 = vmatprep.subr.bf16.mxu0 %v2947_v28 }
 0xcf4   :  { %2453 = vmatpush1.bf16.msra.mxu0 %v2963_v33 }
 0xcf5   :  { %2455 = vmatprep.subr.bf16.mxu0 %v2967_v35 }
 0xcf8   :  { %2457 = vmatpush1.bf16.msra.mxu0 %v2978_v39 }
 0xcf9   :  { %2475 = vmatprep.subr.bf16.mxu0 %v2913_v17 }
 0xdbe   :  { %v706_v18 = vpop.f32.mrb[4].mxu0 }
 0xdbf   :  { %v711_v19 = vadd.f32 %v3003_v45, %v706_v18  ;;  %v708_v20 = vpop.f32.mrb[5].mxu0 }
 0xdc0   :  { %v738_v23 = vadd.f32 %v2302_v13, %v708_v20 }
 0xdc1   :  { %2678 = vtanh.f32 %v711_v19  ;;  %v2301_v26 = vmul.f32 -1.442695, %v711_v19 }
 0xdc2   :  { %2680 = vtanh.f32 %v738_v23  ;;  %v2303_v29 = vmul.f32 -1.442695, %v738_v23 }
 0xdc3   :  { %2682 = vpow2.f32 %v2301_v26 }
 0xdc4   :  { %2684 = vpow2.f32 %v2303_v29 }
 0xdcb   :  { %v2679_v24 = vpop.eup %2678 }
 0xdcc   :  { %v2681_v25 = vpop.eup %2680  ;;  %721 = vrot.lane.b32.xlu1 %v2679_v24, %s2864_s14 }
 0xdcd   :  { %748 = vrot.lane.b32.xlu0 %v2681_v25, %s2864_s14  ;;  %v2683_v30 = vpop.eup %2682 }
 0xdce   :  { %v2685_v31 = vpop.eup %2684  ;;  %v715_v32 = vadd.f32 1.0, %v2683_v30 }
 0xdcf   :  { %v742_v36 = vadd.f32 1.0, %v2685_v31 }
 0xdd0   :  { %2686 = vrcp.f32 %v715_v32 }
 0xdd1   :  { %2688 = vrcp.f32 %v742_v36 }
 0xdda   :  { %v2687_v37 = vpop.eup %2686 }
 0xddb   :  { %v2689_v40 = vpop.eup %2688  ;;  %v719_v44 = vmul.f32 %v2687_v37, %v594_v3 }
 0xddc   :  { %v746_v47 = vmul.f32 %v2689_v40, %v621_v5 }
 0xe3e   :  { %v722_v38 = vpop.permute.xlu1 %721 }
 0xe3f   :  { %v724_v41 = vmul.f32 %v2687_v37, %v722_v38  ;;  %v749_v42 = vpop.permute.xlu0 %748 }
 0xe40   :  { %v751_v43 = vmul.f32 %v2689_v40, %v749_v42 }
 0xe41   :  { %726 = vrot.lane.b32.xlu1 %v724_v41, %s2865_s15 }
 0xe42   :  { %753 = vrot.lane.b32.xlu0 %v751_v43, %s2865_s15  ;;  %v2310_v43 = vld [vmem:[%s3429_s0 + $0x38] sm:$0xff] }
 0xeb3   :  { %v727_v46 = vpop.permute.xlu1 %726 }
 0xeb4   :  { %v729_v48 = vadd.f32 %v727_v46, %v719_v44  ;;  %v754_v49 = vpop.permute.xlu0 %753 }
 0xeb5   :  { %v756_v50 = vadd.f32 %v754_v49, %v746_v47 }
 0xeb6   :  { %2690 = vtanh.f32 %v729_v48 }
 0xeb7   :  { %2692 = vtanh.f32 %v756_v50 }
 0xec0   :  { %v2691_v51 = vpop.eup %2690 }
 0xec1   :  { %v2693_v52 = vpop.eup %2692  ;;  %732 = vrot.lane.b32.xlu1 %v2691_v51, %s2864_s14 }
 0xec2   :  { %759 = vrot.lane.b32.xlu0 %v2693_v52, %s2864_s14 }
 0xf33   :  { %v733_v53 = vpop.permute.xlu1 %732 }
 0xf34   :  { %v3121_v54 = vmul.f32 %v2687_v37, %v733_v53  ;;  %v760_v55 = vpop.permute.xlu0 %759 }
 0xf35   :  { %v762_v56 = vmul.f32 %v2689_v40, %v760_v55 }
 0xf36   :  { %768 = vrot.lane.b32.xlu0 %v3121_v54, %s2864_s14 }
 0xf37   :  { %764 = vrot.lane.b32.xlu1 %v762_v56, %s2865_s15 }
 0xfa8   :  { %v769_v57 = vpop.permute.xlu0 %768 }
 0xfa9   :  { %v765_v58 = vpop.permute.xlu1 %764 }
 0xfaa   :  { %v771_v60 = vsel %vm18_vm0, %v765_v58, %v769_v57 }
 0xfab   :  { %2304 = vmatmul.mubr.msk.f32.vlgmr.msra.gmra.mrb[4].mxu1 %vm92_vm1, %v771_v60 }
 0xfac   :  { %2461 = vmatpush1.bf16.msra.mxu1 %v2924_v21  ;;  %1109 = vmatprep.mubr.f32.mxu1 %v2863_v1 }
 0xfad   :  { %2463 = vmatprep.subr.bf16.mxu1 %v2926_v22 }
 0xfb0   :  { %2465 = vmatpush1.bf16.msra.mxu1 %v2943_v27 }
 0xfb1   :  { %2467 = vmatprep.subr.bf16.mxu1 %v2947_v28 }
 0xfb4   :  { %2469 = vmatpush1.bf16.msra.mxu1 %v2963_v33 }
 0xfb5   :  { %2471 = vmatprep.subr.bf16.mxu1 %v2967_v35 }
 0xfb8   :  { %2473 = vmatpush1.bf16.msra.mxu1 %v2978_v39 }
 0xfb9   :  { %2491 = vmatprep.subr.bf16.mxu1 %v2913_v17 }
0x107e   :  { %v841_v62 = vpop.f32.mrb[4].mxu1 }
0x107f   :  { %v846_v63 = vadd.f32 %v3003_v45, %v841_v62  ;;  %v843_v0 = vpop.f32.mrb[5].mxu1 }
0x1080   :  { %v873_v2 = vadd.f32 %v2306_v61, %v843_v0 }
0x1081   :  { %2694 = vtanh.f32 %v846_v63  ;;  %v2305_v5 = vmul.f32 -1.442695, %v846_v63 }
0x1082   :  { %2696 = vtanh.f32 %v873_v2  ;;  %v2307_v6 = vmul.f32 -1.442695, %v873_v2 }
0x1083   :  { %2698 = vpow2.f32 %v2305_v5 }
0x1084   :  { %2700 = vpow2.f32 %v2307_v6 }
0x108b   :  { %v2695_v3 = vpop.eup %2694 }
0x108c   :  { %v2697_v4 = vpop.eup %2696  ;;  %856 = vrot.lane.b32.xlu1 %v2695_v3, %s2864_s14 }
0x108d   :  { %883 = vrot.lane.b32.xlu0 %v2697_v4, %s2864_s14  ;;  %v2699_v7 = vpop.eup %2698 }
0x108e   :  { %v2701_v8 = vpop.eup %2700  ;;  %v850_v10 = vadd.f32 1.0, %v2699_v7 }
0x108f   :  { %v877_v11 = vadd.f32 1.0, %v2701_v8 }
0x1090   :  { %2702 = vrcp.f32 %v850_v10 }
0x1091   :  { %2704 = vrcp.f32 %v877_v11 }
0x109a   :  { %v2703_v12 = vpop.eup %2702 }
0x109b   :  { %v2705_v16 = vpop.eup %2704  ;;  %v854_v20 = vmul.f32 %v2703_v12, %v729_v48 }
0x109c   :  { %v881_v24 = vmul.f32 %v2705_v16, %v756_v50 }
0x10fe   :  { %v857_v15 = vpop.permute.xlu1 %856 }
0x10ff   :  { %v859_v13 = vmul.f32 %v2703_v12, %v857_v15  ;;  %v884_v18 = vpop.permute.xlu0 %883 }
0x1100   :  { %v886_v19 = vmul.f32 %v2705_v16, %v884_v18 }
0x1101   :  { %861 = vrot.lane.b32.xlu1 %v859_v13, %s2865_s15 }
0x1102   :  { %888 = vrot.lane.b32.xlu0 %v886_v19, %s2865_s15 }
0x1173   :  { %v862_v23 = vpop.permute.xlu1 %861 }
0x1174   :  { %v864_v25 = vadd.f32 %v862_v23, %v854_v20  ;;  %v889_v26 = vpop.permute.xlu0 %888  ;;  %v2314_v20 = vld [vmem:[%s3429_s0 + $0x40] sm:$0xff] }
0x1175   :  { %v891_v29 = vadd.f32 %v889_v26, %v881_v24 }
0x1176   :  { %2706 = vtanh.f32 %v864_v25 }
0x1177   :  { %2708 = vtanh.f32 %v891_v29 }
0x1180   :  { %v2707_v30 = vpop.eup %2706 }
0x1181   :  { %v2709_v31 = vpop.eup %2708  ;;  %867 = vrot.lane.b32.xlu1 %v2707_v30, %s2864_s14 }
0x1182   :  { %894 = vrot.lane.b32.xlu0 %v2709_v31, %s2864_s14 }
0x11f3   :  { %v868_v32 = vpop.permute.xlu1 %867 }
0x11f4   :  { %v870_v36 = vmul.f32 %v2703_v12, %v868_v32  ;;  %v895_v37 = vpop.permute.xlu0 %894 }
0x11f5   :  { %v897_v38 = vmul.f32 %v2705_v16, %v895_v37 }
0x11f6   :  { %903 = vrot.lane.b32.xlu0 %v870_v36, %s2864_s14 }
0x11f7   :  { %899 = vrot.lane.b32.xlu1 %v897_v38, %s2865_s15 }
0x1268   :  { %v3149_v40 = vpop.permute.xlu0 %903 }
0x1269   :  { %v900_v41 = vpop.permute.xlu1 %899 }
0x126a   :  { %v906_v42 = vsel %vm18_vm0, %v900_v41, %v3149_v40 }
0x126b   :  { %2308 = vmatmul.mubr.msk.f32.vlgmr.msra.gmra.mrb[6].mxu0 %vm92_vm1, %v906_v42 }
0x126c   :  { %2477 = vmatpush1.bf16.msra.mxu0 %v2924_v21  ;;  %1244 = vmatprep.mubr.f32.mxu0 %v2863_v1 }
0x126d   :  { %2479 = vmatprep.subr.bf16.mxu0 %v2926_v22 }
0x1270   :  { %2481 = vmatpush1.bf16.msra.mxu0 %v2943_v27 }
0x1271   :  { %2483 = vmatprep.subr.bf16.mxu0 %v2947_v28 }
0x1274   :  { %2485 = vmatpush1.bf16.msra.mxu0 %v2963_v33 }
0x1275   :  { %2487 = vmatprep.subr.bf16.mxu0 %v2967_v35 }
0x1278   :  { %2489 = vmatpush1.bf16.msra.mxu0 %v2978_v39 }
0x1279   :  { %2507 = vmatprep.subr.bf16.mxu0 %v2913_v17 }
0x133e   :  { %v976_v44 = vpop.f32.mrb[6].mxu0 }
0x133f   :  { %v981_v46 = vadd.f32 %v3003_v45, %v976_v44  ;;  %v978_v47 = vpop.f32.mrb[7].mxu0 }
0x1340   :  { %v1008_v48 = vadd.f32 %v2310_v43, %v978_v47 }
0x1341   :  { %2710 = vtanh.f32 %v981_v46  ;;  %v2309_v51 = vmul.f32 -1.442695, %v981_v46 }
0x1342   :  { %2712 = vtanh.f32 %v1008_v48  ;;  %v2311_v52 = vmul.f32 -1.442695, %v1008_v48 }
0x1343   :  { %2714 = vpow2.f32 %v2309_v51 }
0x1344   :  { %2716 = vpow2.f32 %v2311_v52 }
0x134b   :  { %v2711_v49 = vpop.eup %2710 }
0x134c   :  { %v2713_v50 = vpop.eup %2712  ;;  %991 = vrot.lane.b32.xlu1 %v2711_v49, %s2864_s14 }
0x134d   :  { %1018 = vrot.lane.b32.xlu0 %v2713_v50, %s2864_s14  ;;  %v2715_v53 = vpop.eup %2714 }
0x134e   :  { %v2717_v55 = vpop.eup %2716  ;;  %v985_v56 = vadd.f32 1.0, %v2715_v53 }
0x134f   :  { %v1012_v57 = vadd.f32 1.0, %v2717_v55 }
0x1350   :  { %2718 = vrcp.f32 %v985_v56 }
0x1351   :  { %2720 = vrcp.f32 %v1012_v57 }
0x135a   :  { %v2719_v58 = vpop.eup %2718 }
0x135b   :  { %v2721_v61 = vpop.eup %2720  ;;  %v989_v2 = vmul.f32 %v2719_v58, %v864_v25 }
0x135c   :  { %v1016_v4 = vmul.f32 %v2721_v61, %v891_v29 }
0x13be   :  { %v992_v60 = vpop.permute.xlu1 %991 }
0x13bf   :  { %v994_v62 = vmul.f32 %v2719_v58, %v992_v60  ;;  %v1019_v63 = vpop.permute.xlu0 %1018 }
0x13c0   :  { %v1021_v0 = vmul.f32 %v2721_v61, %v1019_v63 }
0x13c1   :  { %996 = vrot.lane.b32.xlu1 %v994_v62, %s2865_s15 }
0x13c2   :  { %1023 = vrot.lane.b32.xlu0 %v1021_v0, %s2865_s15 }
0x1433   :  { %v997_v3 = vpop.permute.xlu1 %996 }
0x1434   :  { %v999_v5 = vadd.f32 %v997_v3, %v989_v2  ;;  %v1024_v6 = vpop.permute.xlu0 %1023  ;;  %v2318_v3 = vld [vmem:[%s3429_s0 + $0x48] sm:$0xff] }
0x1435   :  { %v1026_v7 = vadd.f32 %v1024_v6, %v1016_v4 }
0x1436   :  { %2722 = vtanh.f32 %v999_v5 }
0x1437   :  { %2724 = vtanh.f32 %v1026_v7 }
0x1440   :  { %v2723_v8 = vpop.eup %2722 }
0x1441   :  { %v2725_v10 = vpop.eup %2724  ;;  %1002 = vrot.lane.b32.xlu1 %v2723_v8, %s2864_s14 }
0x1442   :  { %1029 = vrot.lane.b32.xlu0 %v2725_v10, %s2864_s14 }
0x14b3   :  { %v1003_v11 = vpop.permute.xlu1 %1002 }
0x14b4   :  { %v3173_v12 = vmul.f32 %v2719_v58, %v1003_v11  ;;  %v1030_v15 = vpop.permute.xlu0 %1029 }
0x14b5   :  { %v1032_v16 = vmul.f32 %v2721_v61, %v1030_v15 }
0x14b6   :  { %1038 = vrot.lane.b32.xlu0 %v3173_v12, %s2864_s14 }
0x14b7   :  { %1034 = vrot.lane.b32.xlu1 %v1032_v16, %s2865_s15 }
0x1528   :  { %v1039_v13 = vpop.permute.xlu0 %1038 }
0x1529   :  { %v1035_v18 = vpop.permute.xlu1 %1034 }
0x152a   :  { %v1041_v19 = vsel %vm18_vm0, %v1035_v18, %v1039_v13 }
0x152b   :  { %2312 = vmatmul.mubr.msk.f32.vlgmr.msra.gmra.mrb[6].mxu1 %vm92_vm1, %v1041_v19 }
0x152c   :  { %2493 = vmatpush1.bf16.msra.mxu1 %v2924_v21  ;;  %1379 = vmatprep.mubr.f32.mxu1 %v2863_v1 }
0x152d   :  { %2495 = vmatprep.subr.bf16.mxu1 %v2926_v22 }
0x1530   :  { %2497 = vmatpush1.bf16.msra.mxu1 %v2943_v27 }
0x1531   :  { %2499 = vmatprep.subr.bf16.mxu1 %v2947_v28 }
0x1534   :  { %2501 = vmatpush1.bf16.msra.mxu1 %v2963_v33 }
0x1535   :  { %2503 = vmatprep.subr.bf16.mxu1 %v2967_v35 }
0x1538   :  { %2505 = vmatpush1.bf16.msra.mxu1 %v2978_v39 }
0x1539   :  { %2523 = vmatprep.subr.bf16.mxu1 %v2913_v17 }
0x15fe   :  { %v1111_v23 = vpop.f32.mrb[6].mxu1 }
0x15ff   :  { %v1116_v24 = vadd.f32 %v3003_v45, %v1111_v23  ;;  %v1113_v25 = vpop.f32.mrb[7].mxu1 }
0x1600   :  { %v1143_v26 = vadd.f32 %v2314_v20, %v1113_v25 }
0x1601   :  { %2726 = vtanh.f32 %v1116_v24  ;;  %v2313_v31 = vmul.f32 -1.442695, %v1116_v24 }
0x1602   :  { %2728 = vtanh.f32 %v1143_v26  ;;  %v2315_v32 = vmul.f32 -1.442695, %v1143_v26 }
0x1603   :  { %2730 = vpow2.f32 %v2313_v31 }
0x1604   :  { %2732 = vpow2.f32 %v2315_v32 }
0x160b   :  { %v2727_v29 = vpop.eup %2726 }
0x160c   :  { %v2729_v30 = vpop.eup %2728  ;;  %1126 = vrot.lane.b32.xlu1 %v2727_v29, %s2864_s14 }
0x160d   :  { %1153 = vrot.lane.b32.xlu0 %v2729_v30, %s2864_s14  ;;  %v2731_v36 = vpop.eup %2730 }
0x160e   :  { %v2733_v37 = vpop.eup %2732  ;;  %v1120_v38 = vadd.f32 1.0, %v2731_v36 }
0x160f   :  { %v1147_v41 = vadd.f32 1.0, %v2733_v37 }
0x1610   :  { %2734 = vrcp.f32 %v1120_v38 }
0x1611   :  { %2736 = vrcp.f32 %v1147_v41 }
0x161a   :  { %v2735_v42 = vpop.eup %2734 }
0x161b   :  { %v2737_v44 = vpop.eup %2736  ;;  %v1124_v49 = vmul.f32 %v2735_v42, %v999_v5 }
0x161c   :  { %v1151_v51 = vmul.f32 %v2737_v44, %v1026_v7 }
0x167e   :  { %v1127_v43 = vpop.permute.xlu1 %1126 }
0x167f   :  { %v1129_v46 = vmul.f32 %v2735_v42, %v1127_v43  ;;  %v1154_v47 = vpop.permute.xlu0 %1153 }
0x1680   :  { %v1156_v48 = vmul.f32 %v2737_v44, %v1154_v47 }
0x1681   :  { %1131 = vrot.lane.b32.xlu1 %v1129_v46, %s2865_s15 }
0x1682   :  { %1158 = vrot.lane.b32.xlu0 %v1156_v48, %s2865_s15 }
0x16f3   :  { %v1132_v50 = vpop.permute.xlu1 %1131 }
0x16f4   :  { %v1134_v52 = vadd.f32 %v1132_v50, %v1124_v49  ;;  %v1159_v53 = vpop.permute.xlu0 %1158  ;;  %v2322_v50 = vld [vmem:[%s3429_s0 + $0x50] sm:$0xff] }
0x16f5   :  { %v1161_v55 = vadd.f32 %v1159_v53, %v1151_v51 }
0x16f6   :  { %2738 = vtanh.f32 %v1134_v52 }
0x16f7   :  { %2740 = vtanh.f32 %v1161_v55 }
0x1700   :  { %v2739_v56 = vpop.eup %2738 }
0x1701   :  { %v2741_v57 = vpop.eup %2740  ;;  %1137 = vrot.lane.b32.xlu1 %v2739_v56, %s2864_s14 }
0x1702   :  { %1164 = vrot.lane.b32.xlu0 %v2741_v57, %s2864_s14 }
0x1773   :  { %v1138_v58 = vpop.permute.xlu1 %1137 }
0x1774   :  { %v3199_v60 = vmul.f32 %v2735_v42, %v1138_v58  ;;  %v1165_v61 = vpop.permute.xlu0 %1164 }
0x1775   :  { %v1167_v62 = vmul.f32 %v2737_v44, %v1165_v61 }
0x1776   :  { %1173 = vrot.lane.b32.xlu0 %v3199_v60, %s2864_s14 }
0x1777   :  { %1169 = vrot.lane.b32.xlu1 %v1167_v62, %s2865_s15 }
0x17e8   :  { %v1174_v63 = vpop.permute.xlu0 %1173 }
0x17e9   :  { %v1170_v0 = vpop.permute.xlu1 %1169 }
0x17ea   :  { %v1176_v2 = vsel %vm18_vm0, %v1170_v0, %v1174_v63 }
0x17eb   :  { %2316 = vmatmul.mubr.msk.f32.vlgmr.msra.gmra.mrb[8].mxu0 %vm92_vm1, %v1176_v2 }
0x17ec   :  { %2509 = vmatpush1.bf16.msra.mxu0 %v2924_v21  ;;  %1514 = vmatprep.mubr.f32.mxu0 %v2863_v1 }
0x17ed   :  { %2511 = vmatprep.subr.bf16.mxu0 %v2926_v22 }
0x17f0   :  { %2513 = vmatpush1.bf16.msra.mxu0 %v2943_v27 }
0x17f1   :  { %2515 = vmatprep.subr.bf16.mxu0 %v2947_v28 }
0x17f4   :  { %2517 = vmatpush1.bf16.msra.mxu0 %v2963_v33 }
0x17f5   :  { %2519 = vmatprep.subr.bf16.mxu0 %v2967_v35 }
0x17f8   :  { %2521 = vmatpush1.bf16.msra.mxu0 %v2978_v39 }
0x17f9   :  { %2539 = vmatprep.subr.bf16.mxu0 %v2913_v17 }
0x18be   :  { %v1246_v4 = vpop.f32.mrb[8].mxu0 }
0x18bf   :  { %v1251_v5 = vadd.f32 %v3003_v45, %v1246_v4  ;;  %v1248_v6 = vpop.f32.mrb[9].mxu0 }
0x18c0   :  { %v1278_v7 = vadd.f32 %v2318_v3, %v1248_v6 }
0x18c1   :  { %2742 = vtanh.f32 %v1251_v5  ;;  %v2317_v11 = vmul.f32 -1.442695, %v1251_v5 }
0x18c2   :  { %2744 = vtanh.f32 %v1278_v7  ;;  %v2319_v15 = vmul.f32 -1.442695, %v1278_v7 }
0x18c3   :  { %2746 = vpow2.f32 %v2317_v11 }
0x18c4   :  { %2748 = vpow2.f32 %v2319_v15 }
0x18cb   :  { %v2743_v8 = vpop.eup %2742 }
0x18cc   :  { %v2745_v10 = vpop.eup %2744  ;;  %1261 = vrot.lane.b32.xlu1 %v2743_v8, %s2864_s14 }
0x18cd   :  { %1288 = vrot.lane.b32.xlu0 %v2745_v10, %s2864_s14  ;;  %v2747_v16 = vpop.eup %2746 }
0x18ce   :  { %v2749_v13 = vpop.eup %2748  ;;  %v1255_v18 = vadd.f32 1.0, %v2747_v16 }
0x18cf   :  { %v1282_v19 = vadd.f32 1.0, %v2749_v13 }
0x18d0   :  { %2750 = vrcp.f32 %v1255_v18 }
0x18d1   :  { %2752 = vrcp.f32 %v1282_v19 }
0x18da   :  { %v2751_v45 = vpop.eup %2750 }
0x18db   :  { %v2753_v23 = vpop.eup %2752  ;;  %v1259_v29 = vmul.f32 %v2751_v45, %v1134_v52  ;;  %v3247_v52 = vld [vmem:[%s3431_s2] ss:$0 sm:$0xff] }
0x18dc   :  { %v1286_v31 = vmul.f32 %v2753_v23, %v1161_v55 }
0x193e   :  { %v1262_v20 = vpop.permute.xlu1 %1261 }
0x193f   :  { %v1264_v24 = vmul.f32 %v2751_v45, %v1262_v20  ;;  %v1289_v25 = vpop.permute.xlu0 %1288 }
0x1940   :  { %v1291_v26 = vmul.f32 %v2753_v23, %v1289_v25 }
0x1941   :  { %1266 = vrot.lane.b32.xlu1 %v1264_v24, %s2865_s15 }
0x1942   :  { %1293 = vrot.lane.b32.xlu0 %v1291_v26, %s2865_s15 }
0x19b3   :  { %v1267_v30 = vpop.permute.xlu1 %1266 }
0x19b4   :  { %v1269_v32 = vadd.f32 %v1267_v30, %v1259_v29  ;;  %v1294_v36 = vpop.permute.xlu0 %1293 }
0x19b5   :  { %v1296_v37 = vadd.f32 %v1294_v36, %v1286_v31 }
0x19b6   :  { %2754 = vtanh.f32 %v1269_v32 }
0x19b7   :  { %2756 = vtanh.f32 %v1296_v37 }
0x19c0   :  { %v2755_v38 = vpop.eup %2754 }
0x19c1   :  { %v2757_v41 = vpop.eup %2756  ;;  %1272 = vrot.lane.b32.xlu1 %v2755_v38, %s2864_s14 }
0x19c2   :  { %1299 = vrot.lane.b32.xlu0 %v2757_v41, %s2864_s14 }
0x1a33   :  { %v1273_v42 = vpop.permute.xlu1 %1272 }
0x1a34   :  { %v3225_v43 = vmul.f32 %v2751_v45, %v1273_v42  ;;  %v1300_v44 = vpop.permute.xlu0 %1299 }
0x1a35   :  { %v1302_v46 = vmul.f32 %v2753_v23, %v1300_v44 }
0x1a36   :  { %1308 = vrot.lane.b32.xlu0 %v3225_v43, %s2864_s14 }
0x1a37   :  { %1304 = vrot.lane.b32.xlu1 %v1302_v46, %s2865_s15 }
0x1aa8   :  { %v1309_v47 = vpop.permute.xlu0 %1308 }
0x1aa9   :  { %v1305_v48 = vpop.permute.xlu1 %1304 }
0x1aaa   :  { %v1311_v49 = vsel %vm18_vm0, %v1305_v48, %v1309_v47 }
0x1aab   :  { %2320 = vmatmul.mubr.msk.f32.vlgmr.msra.gmra.mrb[8].mxu1 %vm92_vm1, %v1311_v49 }
0x1aac   :  { %2525 = vmatpush1.bf16.msra.mxu1 %v2924_v21  ;;  %1649 = vmatprep.mubr.f32.mxu1 %v2863_v1 }
0x1aad   :  { %2527 = vmatprep.subr.bf16.mxu1 %v2926_v22 }
0x1ab0   :  { %2529 = vmatpush1.bf16.msra.mxu1 %v2943_v27 }
0x1ab1   :  { %2531 = vmatprep.subr.bf16.mxu1 %v2947_v28 }
0x1ab4   :  { %2533 = vmatpush1.bf16.msra.mxu1 %v2963_v33 }
0x1ab5   :  { %2535 = vmatprep.subr.bf16.mxu1 %v2967_v35 }
0x1ab8   :  { %2537 = vmatpush1.bf16.msra.mxu1 %v2978_v39 }
0x1ab9   :  { %2555 = vmatprep.subr.bf16.mxu1 %v2913_v17 }
0x1b7e   :  { %v1381_v51 = vpop.f32.mrb[8].mxu1 }
0x1b7f   :  { %v1386_v53 = vadd.f32 %v3247_v52, %v1381_v51  ;;  %v1383_v55 = vpop.f32.mrb[9].mxu1 }
0x1b80   :  { %v1413_v56 = vadd.f32 %v2322_v50, %v1383_v55 }
0x1b81   :  { %2758 = vtanh.f32 %v1386_v53  ;;  %v2321_v61 = vmul.f32 -1.442695, %v1386_v53 }
0x1b82   :  { %2760 = vtanh.f32 %v1413_v56  ;;  %v2323_v62 = vmul.f32 -1.442695, %v1413_v56 }
0x1b83   :  { %2762 = vpow2.f32 %v2321_v61 }
0x1b84   :  { %2764 = vpow2.f32 %v2323_v62 }
0x1b8b   :  { %v2759_v57 = vpop.eup %2758 }
0x1b8c   :  { %v2761_v58 = vpop.eup %2760  ;;  %1396 = vrot.lane.b32.xlu1 %v2759_v57, %s2864_s14 }
0x1b8d   :  { %1423 = vrot.lane.b32.xlu0 %v2761_v58, %s2864_s14  ;;  %v2763_v63 = vpop.eup %2762 }
0x1b8e   :  { %v2765_v0 = vpop.eup %2764  ;;  %v1390_v2 = vadd.f32 1.0, %v2763_v63 }
0x1b8f   :  { %v1417_v3 = vadd.f32 1.0, %v2765_v0 }
0x1b90   :  { %2766 = vrcp.f32 %v1390_v2 }
0x1b91   :  { %2768 = vrcp.f32 %v1417_v3 }
0x1b9a   :  { %v2767_v4 = vpop.eup %2766 }
0x1b9b   :  { %v2769_v6 = vpop.eup %2768  ;;  %v1394_v11 = vmul.f32 %v2767_v4, %v1269_v32  ;;  %v2326_v32 = vld [vmem:[%s3429_s0 + $0x58] sm:$0xff] }
0x1b9c   :  { %v1421_v16 = vmul.f32 %v2769_v6, %v1296_v37 }
0x1bfe   :  { %v1397_v5 = vpop.permute.xlu1 %1396 }
0x1bff   :  { %v1399_v7 = vmul.f32 %v2767_v4, %v1397_v5  ;;  %v1424_v8 = vpop.permute.xlu0 %1423 }
0x1c00   :  { %v1426_v10 = vmul.f32 %v2769_v6, %v1424_v8 }
0x1c01   :  { %1401 = vrot.lane.b32.xlu1 %v1399_v7, %s2865_s15 }
0x1c02   :  { %1428 = vrot.lane.b32.xlu0 %v1426_v10, %s2865_s15 }
0x1c73   :  { %v1402_v15 = vpop.permute.xlu1 %1401 }
0x1c74   :  { %v1404_v13 = vadd.f32 %v1402_v15, %v1394_v11  ;;  %v1429_v18 = vpop.permute.xlu0 %1428 }
0x1c75   :  { %v1431_v19 = vadd.f32 %v1429_v18, %v1421_v16  ;;  %v2330_v18 = vld [vmem:[%s3429_s0 + $0x60] sm:$0xff] }
0x1c76   :  { %2770 = vtanh.f32 %v1404_v13 }
0x1c77   :  { %2772 = vtanh.f32 %v1431_v19 }
0x1c80   :  { %v2771_v45 = vpop.eup %2770 }
0x1c81   :  { %v2773_v20 = vpop.eup %2772  ;;  %1407 = vrot.lane.b32.xlu1 %v2771_v45, %s2864_s14 }
0x1c82   :  { %1434 = vrot.lane.b32.xlu0 %v2773_v20, %s2864_s14 }
0x1cf3   :  { %v1408_v23 = vpop.permute.xlu1 %1407 }
0x1cf4   :  { %v1410_v24 = vmul.f32 %v2767_v4, %v1408_v23  ;;  %v1435_v25 = vpop.permute.xlu0 %1434 }
0x1cf5   :  { %v1437_v26 = vmul.f32 %v2769_v6, %v1435_v25 }
0x1cf6   :  { %1443 = vrot.lane.b32.xlu0 %v1410_v24, %s2864_s14 }
0x1cf7   :  { %1439 = vrot.lane.b32.xlu1 %v1437_v26, %s2865_s15 }
0x1d68   :  { %v3258_v29 = vpop.permute.xlu0 %1443 }
0x1d69   :  { %v1440_v30 = vpop.permute.xlu1 %1439 }
0x1d6a   :  { %v1446_v31 = vsel %vm18_vm0, %v1440_v30, %v3258_v29 }
0x1d6b   :  { %2324 = vmatmul.mubr.msk.f32.vlgmr.msra.gmra.mrb[10].mxu0 %vm92_vm1, %v1446_v31 }
0x1d6c   :  { %2541 = vmatpush1.bf16.msra.mxu0 %v2924_v21  ;;  %1784 = vmatprep.mubr.f32.mxu0 %v2863_v1 }
0x1d6d   :  { %2543 = vmatprep.subr.bf16.mxu0 %v2926_v22 }
0x1d70   :  { %2545 = vmatpush1.bf16.msra.mxu0 %v2943_v27 }
0x1d71   :  { %2547 = vmatprep.subr.bf16.mxu0 %v2947_v28 }
0x1d74   :  { %2549 = vmatpush1.bf16.msra.mxu0 %v2963_v33 }
0x1d75   :  { %2551 = vmatprep.subr.bf16.mxu0 %v2967_v35 }
0x1d78   :  { %2553 = vmatpush1.bf16.msra.mxu0 %v2978_v39 }
0x1d79   :  { %2571 = vmatprep.subr.bf16.mxu0 %v2913_v17 }
0x1e3e   :  { %v1516_v36 = vpop.f32.mrb[10].mxu0 }
0x1e3f   :  { %v1521_v37 = vadd.f32 %v3247_v52, %v1516_v36  ;;  %v1518_v38 = vpop.f32.mrb[11].mxu0 }
0x1e40   :  { %v1548_v41 = vadd.f32 %v2326_v32, %v1518_v38 }
0x1e41   :  { %2774 = vtanh.f32 %v1521_v37  ;;  %v2325_v46 = vmul.f32 -1.442695, %v1521_v37 }
0x1e42   :  { %2776 = vtanh.f32 %v1548_v41  ;;  %v2327_v47 = vmul.f32 -1.442695, %v1548_v41 }
0x1e43   :  { %2778 = vpow2.f32 %v2325_v46 }
0x1e44   :  { %2780 = vpow2.f32 %v2327_v47 }
0x1e4b   :  { %v2775_v42 = vpop.eup %2774 }
0x1e4c   :  { %v2777_v44 = vpop.eup %2776  ;;  %1531 = vrot.lane.b32.xlu1 %v2775_v42, %s2864_s14 }
0x1e4d   :  { %1558 = vrot.lane.b32.xlu0 %v2777_v44, %s2864_s14  ;;  %v2779_v48 = vpop.eup %2778 }
0x1e4e   :  { %v2781_v49 = vpop.eup %2780  ;;  %v1525_v50 = vadd.f32 1.0, %v2779_v48 }
0x1e4f   :  { %v1552_v51 = vadd.f32 1.0, %v2781_v49 }
0x1e50   :  { %2782 = vrcp.f32 %v1525_v50 }
0x1e51   :  { %2784 = vrcp.f32 %v1552_v51 }
0x1e5a   :  { %v2783_v53 = vpop.eup %2782 }
0x1e5b   :  { %v2785_v56 = vpop.eup %2784  ;;  %v1529_v62 = vmul.f32 %v2783_v53, %v1404_v13 }
0x1e5c   :  { %v1556_v0 = vmul.f32 %v2785_v56, %v1431_v19 }
0x1ebe   :  { %v1532_v55 = vpop.permute.xlu1 %1531 }
0x1ebf   :  { %v1534_v57 = vmul.f32 %v2783_v53, %v1532_v55  ;;  %v1559_v58 = vpop.permute.xlu0 %1558 }
0x1ec0   :  { %v1561_v61 = vmul.f32 %v2785_v56, %v1559_v58 }
0x1ec1   :  { %1536 = vrot.lane.b32.xlu1 %v1534_v57, %s2865_s15 }
0x1ec2   :  { %1563 = vrot.lane.b32.xlu0 %v1561_v61, %s2865_s15 }
0x1f33   :  { %v1537_v63 = vpop.permute.xlu1 %1536 }
0x1f34   :  { %v1539_v2 = vadd.f32 %v1537_v63, %v1529_v62  ;;  %v1564_v3 = vpop.permute.xlu0 %1563 }
0x1f35   :  { %v1566_v4 = vadd.f32 %v1564_v3, %v1556_v0  ;;  %v2334_v3 = vld [vmem:[%s3429_s0 + $0x68] sm:$0xff] }
0x1f36   :  { %2786 = vtanh.f32 %v1539_v2 }
0x1f37   :  { %2788 = vtanh.f32 %v1566_v4 }
0x1f40   :  { %v2787_v5 = vpop.eup %2786 }
0x1f41   :  { %v2789_v6 = vpop.eup %2788  ;;  %1542 = vrot.lane.b32.xlu1 %v2787_v5, %s2864_s14 }
0x1f42   :  { %1569 = vrot.lane.b32.xlu0 %v2789_v6, %s2864_s14 }
0x1fb3   :  { %v1543_v7 = vpop.permute.xlu1 %1542 }
0x1fb4   :  { %v3282_v8 = vmul.f32 %v2783_v53, %v1543_v7  ;;  %v1570_v10 = vpop.permute.xlu0 %1569 }
0x1fb5   :  { %v1572_v11 = vmul.f32 %v2785_v56, %v1570_v10 }
0x1fb6   :  { %1578 = vrot.lane.b32.xlu0 %v3282_v8, %s2864_s14 }
0x1fb7   :  { %1574 = vrot.lane.b32.xlu1 %v1572_v11, %s2865_s15 }
0x2028   :  { %v1579_v15 = vpop.permute.xlu0 %1578 }
0x2029   :  { %v1575_v16 = vpop.permute.xlu1 %1574 }
0x202a   :  { %v1581_v13 = vsel %vm18_vm0, %v1575_v16, %v1579_v15 }
0x202b   :  { %2328 = vmatmul.mubr.msk.f32.vlgmr.msra.gmra.mrb[10].mxu1 %vm92_vm1, %v1581_v13 }
0x202c   :  { %2557 = vmatpush1.bf16.msra.mxu1 %v2924_v21  ;;  %1919 = vmatprep.mubr.f32.mxu1 %v2863_v1 }
0x202d   :  { %2559 = vmatprep.subr.bf16.mxu1 %v2926_v22 }
0x2030   :  { %2561 = vmatpush1.bf16.msra.mxu1 %v2943_v27 }
0x2031   :  { %2563 = vmatprep.subr.bf16.mxu1 %v2947_v28 }
0x2034   :  { %2565 = vmatpush1.bf16.msra.mxu1 %v2963_v33 }
0x2035   :  { %2567 = vmatprep.subr.bf16.mxu1 %v2967_v35 }
0x2038   :  { %2569 = vmatpush1.bf16.msra.mxu1 %v2978_v39 }
0x2039   :  { %2587 = vmatprep.subr.bf16.mxu1 %v2913_v17 }
0x20fe   :  { %v1651_v19 = vpop.f32.mrb[10].mxu1 }
0x20ff   :  { %v1656_v45 = vadd.f32 %v3247_v52, %v1651_v19  ;;  %v1653_v20 = vpop.f32.mrb[11].mxu1 }
0x2100   :  { %v1683_v23 = vadd.f32 %v2330_v18, %v1653_v20 }
0x2101   :  { %2790 = vtanh.f32 %v1656_v45  ;;  %v2329_v26 = vmul.f32 -1.442695, %v1656_v45 }
0x2102   :  { %2792 = vtanh.f32 %v1683_v23  ;;  %v2331_v30 = vmul.f32 -1.442695, %v1683_v23 }
0x2103   :  { %2794 = vpow2.f32 %v2329_v26 }
0x2104   :  { %2796 = vpow2.f32 %v2331_v30 }
0x210b   :  { %v2791_v24 = vpop.eup %2790 }
0x210c   :  { %v2793_v25 = vpop.eup %2792  ;;  %1666 = vrot.lane.b32.xlu1 %v2791_v24, %s2864_s14 }
0x210d   :  { %1693 = vrot.lane.b32.xlu0 %v2793_v25, %s2864_s14  ;;  %v2795_v17 = vpop.eup %2794 }
0x210e   :  { %v2797_v31 = vpop.eup %2796  ;;  %v1660_v32 = vadd.f32 1.0, %v2795_v17 }
0x210f   :  { %v1687_v36 = vadd.f32 1.0, %v2797_v31 }
0x2110   :  { %2798 = vrcp.f32 %v1660_v32 }
0x2111   :  { %2800 = vrcp.f32 %v1687_v36 }
0x211a   :  { %v2799_v37 = vpop.eup %2798 }
0x211b   :  { %v2801_v41 = vpop.eup %2800  ;;  %v1664_v47 = vmul.f32 %v2799_v37, %v1539_v2 }
0x211c   :  { %v1691_v49 = vmul.f32 %v2801_v41, %v1566_v4 }
0x217e   :  { %v1667_v38 = vpop.permute.xlu1 %1666 }
0x217f   :  { %v1669_v42 = vmul.f32 %v2799_v37, %v1667_v38  ;;  %v1694_v44 = vpop.permute.xlu0 %1693 }
0x2180   :  { %v1696_v46 = vmul.f32 %v2801_v41, %v1694_v44 }
0x2181   :  { %1671 = vrot.lane.b32.xlu1 %v1669_v42, %s2865_s15 }
0x2182   :  { %1698 = vrot.lane.b32.xlu0 %v1696_v46, %s2865_s15 }
0x21f3   :  { %v1672_v48 = vpop.permute.xlu1 %1671 }
0x21f4   :  { %v1674_v50 = vadd.f32 %v1672_v48, %v1664_v47  ;;  %v1699_v51 = vpop.permute.xlu0 %1698 }
0x21f5   :  { %v1701_v53 = vadd.f32 %v1699_v51, %v1691_v49 }
0x21f6   :  { %2802 = vtanh.f32 %v1674_v50 }
0x21f7   :  { %2804 = vtanh.f32 %v1701_v53 }
0x2200   :  { %v2803_v55 = vpop.eup %2802 }
0x2201   :  { %v2805_v56 = vpop.eup %2804  ;;  %1677 = vrot.lane.b32.xlu1 %v2803_v55, %s2864_s14 }
0x2202   :  { %1704 = vrot.lane.b32.xlu0 %v2805_v56, %s2864_s14 }
0x2273   :  { %v1678_v57 = vpop.permute.xlu1 %1677 }
0x2274   :  { %v3308_v58 = vmul.f32 %v2799_v37, %v1678_v57  ;;  %v1705_v61 = vpop.permute.xlu0 %1704 }
0x2275   :  { %v1707_v62 = vmul.f32 %v2801_v41, %v1705_v61 }
0x2276   :  { %1713 = vrot.lane.b32.xlu0 %v3308_v58, %s2864_s14 }
0x2277   :  { %1709 = vrot.lane.b32.xlu1 %v1707_v62, %s2865_s15 }
0x22e8   :  { %v1714_v63 = vpop.permute.xlu0 %1713 }
0x22e9   :  { %v1710_v0 = vpop.permute.xlu1 %1709 }
0x22ea   :  { %v1716_v2 = vsel %vm18_vm0, %v1710_v0, %v1714_v63 }
0x22eb   :  { %2332 = vmatmul.mubr.msk.f32.vlgmr.msra.gmra.mrb[12].mxu0 %vm92_vm1, %v1716_v2 }
0x22ec   :  { %2573 = vmatpush1.bf16.msra.mxu0 %v2924_v21  ;;  %2054 = vmatprep.mubr.f32.mxu0 %v2863_v1 }
0x22ed   :  { %2575 = vmatprep.subr.bf16.mxu0 %v2926_v22 }
0x22f0   :  { %2577 = vmatpush1.bf16.msra.mxu0 %v2943_v27 }
0x22f1   :  { %2579 = vmatprep.subr.bf16.mxu0 %v2947_v28 }
0x22f4   :  { %2581 = vmatpush1.bf16.msra.mxu0 %v2963_v33 }
0x22f5   :  { %2583 = vmatprep.subr.bf16.mxu0 %v2967_v35 }
0x22f8   :  { %2585 = vmatpush1.bf16.msra.mxu0 %v2978_v39 }
0x23be   :  { %v1786_v4 = vpop.f32.mrb[12].mxu0 }
0x23bf   :  { %v1791_v5 = vadd.f32 %v3247_v52, %v1786_v4  ;;  %v1788_v6 = vpop.f32.mrb[13].mxu0 }
0x23c0   :  { %v1818_v7 = vadd.f32 %v2334_v3, %v1788_v6 }
0x23c1   :  { %2806 = vtanh.f32 %v1791_v5  ;;  %v2333_v15 = vmul.f32 -1.442695, %v1791_v5 }
0x23c2   :  { %2808 = vtanh.f32 %v1818_v7  ;;  %v2335_v16 = vmul.f32 -1.442695, %v1818_v7 }
0x23c3   :  { %2810 = vpow2.f32 %v2333_v15 }
0x23c4   :  { %2812 = vpow2.f32 %v2335_v16 }
0x23cb   :  { %v2807_v10 = vpop.eup %2806 }
0x23cc   :  { %v2809_v11 = vpop.eup %2808  ;;  %1801 = vrot.lane.b32.xlu1 %v2807_v10, %s2864_s14 }
0x23cd   :  { %1828 = vrot.lane.b32.xlu0 %v2809_v11, %s2864_s14  ;;  %v2811_v13 = vpop.eup %2810 }
0x23ce   :  { %v2813_v18 = vpop.eup %2812  ;;  %v1795_v19 = vadd.f32 1.0, %v2811_v13 }
0x23cf   :  { %v1822_v45 = vadd.f32 1.0, %v2813_v18 }
0x23d0   :  { %2814 = vrcp.f32 %v1795_v19 }
0x23d1   :  { %2816 = vrcp.f32 %v1822_v45 }
0x23da   :  { %v2815_v20 = vpop.eup %2814 }
0x23db   :  { %v2817_v24 = vpop.eup %2816  ;;  %v1799_v17 = vmul.f32 %v2815_v20, %v1674_v50 }
0x23dc   :  { %v1826_v32 = vmul.f32 %v2817_v24, %v1701_v53  ;;  %v2338_v53 = vld [vmem:[%s3429_s0 + $0x70] sm:$0xff] }
0x243e   :  { %v1802_v23 = vpop.permute.xlu1 %1801 }
0x243f   :  { %v1804_v25 = vmul.f32 %v2815_v20, %v1802_v23  ;;  %v1829_v26 = vpop.permute.xlu0 %1828 }
0x2440   :  { %v1831_v30 = vmul.f32 %v2817_v24, %v1829_v26  ;;  %v2342_v26 = vld [vmem:[%s3429_s0 + $0x78] sm:$0xff]  ;;  %s2866_s0 = smov 96  }
0x2441   :  { %1806 = vrot.lane.b32.xlu1 %v1804_v25, %s2865_s15 }
0x2442   :  { %1833 = vrot.lane.b32.xlu0 %v1831_v30, %s2865_s15 }
0x24b3   :  { %v1807_v31 = vpop.permute.xlu1 %1806 }
0x24b4   :  { %v1809_v36 = vadd.f32 %v1807_v31, %v1799_v17  ;;  %v1834_v37 = vpop.permute.xlu0 %1833 }
0x24b5   :  { %v1836_v38 = vadd.f32 %v1834_v37, %v1826_v32 }
0x24b6   :  { %2818 = vtanh.f32 %v1809_v36 }
0x24b7   :  { %2820 = vtanh.f32 %v1836_v38 }
0x24c0   :  { %v2819_v41 = vpop.eup %2818 }
0x24c1   :  { %v2821_v42 = vpop.eup %2820  ;;  %1812 = vrot.lane.b32.xlu1 %v2819_v41, %s2864_s14 }
0x24c2   :  { %1839 = vrot.lane.b32.xlu0 %v2821_v42, %s2864_s14 }
0x2533   :  { %v1813_v44 = vpop.permute.xlu1 %1812 }
0x2534   :  { %v3333_v46 = vmul.f32 %v2815_v20, %v1813_v44  ;;  %v1840_v47 = vpop.permute.xlu0 %1839 }
0x2535   :  { %v1842_v48 = vmul.f32 %v2817_v24, %v1840_v47 }
0x2536   :  { %1848 = vrot.lane.b32.xlu0 %v3333_v46, %s2864_s14 }
0x2537   :  { %1844 = vrot.lane.b32.xlu1 %v1842_v48, %s2865_s15 }
0x25a8   :  { %v1849_v49 = vpop.permute.xlu0 %1848 }
0x25a9   :  { %v1845_v50 = vpop.permute.xlu1 %1844 }
0x25aa   :  { %v1851_v51 = vsel %vm18_vm0, %v1845_v50, %v1849_v49 }
0x25ab   :  { %2336 = vmatmul.mubr.msk.f32.vlgmr.msra.gmra.mrb[12].mxu1 %vm92_vm1, %v1851_v51 }
0x25ac   :  { %2589 = vmatpush1.bf16.msra.mxu1 %v2924_v21  ;;  %2189 = vmatprep.mubr.f32.mxu1 %v2863_v1 }
0x25ad   :  { %2591 = vmatprep.subr.bf16.mxu1 %v2926_v22 }
0x25b0   :  { %2593 = vmatpush1.bf16.msra.mxu1 %v2943_v27 }
0x25b1   :  { %2595 = vmatprep.subr.bf16.mxu1 %v2947_v28 }
0x25b4   :  { %2597 = vmatpush1.bf16.msra.mxu1 %v2963_v33 }
0x25b5   :  { %2599 = vmatprep.subr.bf16.mxu1 %v2967_v35 }
0x25b8   :  { %2601 = vmatpush1.bf16.msra.mxu1 %v2978_v39 }
0x267e   :  { %v1921_v55 = vpop.f32.mrb[12].mxu1 }
0x267f   :  { %v1926_v21 = vadd.f32 %v3247_v52, %v1921_v55  ;;  %v1923_v1 = vpop.f32.mrb[13].mxu1 }
0x2680   :  { %v1953_v56 = vadd.f32 %v2338_v53, %v1923_v1 }
0x2681   :  { %2822 = vtanh.f32 %v1926_v21  ;;  %v2337_v28 = vmul.f32 -1.442695, %v1926_v21 }
0x2682   :  { %2824 = vtanh.f32 %v1953_v56  ;;  %v2339_v33 = vmul.f32 -1.442695, %v1953_v56 }
0x2683   :  { %2826 = vpow2.f32 %v2337_v28 }
0x2684   :  { %2828 = vpow2.f32 %v2339_v33 }
0x268b   :  { %v2823_v22 = vpop.eup %2822 }
0x268c   :  { %v2825_v27 = vpop.eup %2824  ;;  %1936 = vrot.lane.b32.xlu1 %v2823_v22, %s2864_s14 }
0x268d   :  { %1963 = vrot.lane.b32.xlu0 %v2825_v27, %s2864_s14  ;;  %v2827_v35 = vpop.eup %2826 }
0x268e   :  { %v2829_v39 = vpop.eup %2828  ;;  %v1930_v57 = vadd.f32 1.0, %v2827_v35 }
0x268f   :  { %v1957_v61 = vadd.f32 1.0, %v2829_v39 }
0x2690   :  { %2830 = vrcp.f32 %v1930_v57 }
0x2691   :  { %2832 = vrcp.f32 %v1957_v61 }
0x269a   :  { %v2831_v62 = vpop.eup %2830 }
0x269b   :  { %v2833_v0 = vpop.eup %2832  ;;  %v1934_v5 = vmul.f32 %v2831_v62, %v1809_v36 }
0x269c   :  { %v1961_v7 = vmul.f32 %v2833_v0, %v1836_v38 }
0x26fe   :  { %v1937_v63 = vpop.permute.xlu1 %1936 }
0x26ff   :  { %v1939_v2 = vmul.f32 %v2831_v62, %v1937_v63  ;;  %v1964_v3 = vpop.permute.xlu0 %1963 }
0x2700   :  { %v1966_v4 = vmul.f32 %v2833_v0, %v1964_v3 }
0x2701   :  { %1941 = vrot.lane.b32.xlu1 %v1939_v2, %s2865_s15 }
0x2702   :  { %1968 = vrot.lane.b32.xlu0 %v1966_v4, %s2865_s15 }
0x2773   :  { %v1942_v6 = vpop.permute.xlu1 %1941 }
0x2774   :  { %v1944_v10 = vadd.f32 %v1942_v6, %v1934_v5  ;;  %v1969_v11 = vpop.permute.xlu0 %1968 }
0x2775   :  { %v1971_v15 = vadd.f32 %v1969_v11, %v1961_v7 }
0x2776   :  { %2834 = vtanh.f32 %v1944_v10 }
0x2777   :  { %2836 = vtanh.f32 %v1971_v15 }
0x2780   :  { %v2835_v16 = vpop.eup %2834 }
0x2781   :  { %v2837_v13 = vpop.eup %2836  ;;  %1947 = vrot.lane.b32.xlu1 %v2835_v16, %s2864_s14 }
0x2782   :  { %1974 = vrot.lane.b32.xlu0 %v2837_v13, %s2864_s14 }
0x27f3   :  { %v1948_v18 = vpop.permute.xlu1 %1947 }
0x27f4   :  { %v1950_v19 = vmul.f32 %v2831_v62, %v1948_v18  ;;  %v1975_v45 = vpop.permute.xlu0 %1974 }
0x27f5   :  { %v1977_v20 = vmul.f32 %v2833_v0, %v1975_v45 }
0x27f6   :  { %1983 = vrot.lane.b32.xlu0 %v1950_v19, %s2864_s14 }
0x27f7   :  { %1979 = vrot.lane.b32.xlu1 %v1977_v20, %s2865_s15 }
0x2868   :  { %v3360_v23 = vpop.permute.xlu0 %1983 }
0x2869   :  { %v1980_v24 = vpop.permute.xlu1 %1979 }
0x286a   :  { %v1986_v25 = vsel %vm18_vm0, %v1980_v24, %v3360_v23 }
0x286b   :  { %2340 = vmatmul.mubr.msk.f32.vlgmr.msra.gmra.mrb[14].mxu0 %vm92_vm1, %v1986_v25 }
0x293e   :  { %v2056_v30 = vpop.f32.mrb[14].mxu0 }
0x293f   :  { %v2061_v17 = vadd.f32 %v3247_v52, %v2056_v30  ;;  %v2058_v31 = vpop.f32.mrb[15].mxu0 }
0x2940   :  { %v2088_v32 = vadd.f32 %v2342_v26, %v2058_v31 }
0x2941   :  { %2838 = vtanh.f32 %v2061_v17  ;;  %v2341_v38 = vmul.f32 -1.442695, %v2061_v17 }
0x2942   :  { %2840 = vtanh.f32 %v2088_v32  ;;  %v2343_v41 = vmul.f32 -1.442695, %v2088_v32 }
0x2943   :  { %2842 = vpow2.f32 %v2341_v38 }
0x2944   :  { %2844 = vpow2.f32 %v2343_v41 }
0x294b   :  { %v2839_v36 = vpop.eup %2838 }
0x294c   :  { %v2841_v37 = vpop.eup %2840  ;;  %2071 = vrot.lane.b32.xlu1 %v2839_v36, %s2864_s14 }
0x294d   :  { %2098 = vrot.lane.b32.xlu0 %v2841_v37, %s2864_s14  ;;  %v2843_v42 = vpop.eup %2842 }
0x294e   :  { %v2845_v44 = vpop.eup %2844  ;;  %v2065_v47 = vadd.f32 1.0, %v2843_v42 }
0x294f   :  { %v2092_v48 = vadd.f32 1.0, %v2845_v44 }
0x2950   :  { %2846 = vrcp.f32 %v2065_v47 }
0x2951   :  { %2848 = vrcp.f32 %v2092_v48 }
0x295a   :  { %v2847_v49 = vpop.eup %2846 }
0x295b   :  { %v2849_v51 = vpop.eup %2848  ;;  %v2069_v1 = vmul.f32 %v2847_v49, %v1944_v10 }
0x295c   :  { %v2096_v22 = vmul.f32 %v2849_v51, %v1971_v15 }
0x29be   :  { %v2072_v50 = vpop.permute.xlu1 %2071 }
0x29bf   :  { %v2074_v53 = vmul.f32 %v2847_v49, %v2072_v50  ;;  %v2099_v55 = vpop.permute.xlu0 %2098 }
0x29c0   :  { %v2101_v21 = vmul.f32 %v2849_v51, %v2099_v55 }
0x29c1   :  { %2076 = vrot.lane.b32.xlu1 %v2074_v53, %s2865_s15 }
0x29c2   :  { %2103 = vrot.lane.b32.xlu0 %v2101_v21, %s2865_s15 }
0x2a33   :  { %v2077_v56 = vpop.permute.xlu1 %2076 }
0x2a34   :  { %v2079_v27 = vadd.f32 %v2077_v56, %v2069_v1  ;;  %v2104_v28 = vpop.permute.xlu0 %2103 }
0x2a35   :  { %v2106_v33 = vadd.f32 %v2104_v28, %v2096_v22 }
0x2a36   :  { %2850 = vtanh.f32 %v2079_v27 }
0x2a37   :  { %2852 = vtanh.f32 %v2106_v33 }
0x2a40   :  { %v2851_v35 = vpop.eup %2850 }
0x2a41   :  { %v2853_v39 = vpop.eup %2852  ;;  %2082 = vrot.lane.b32.xlu1 %v2851_v35, %s2864_s14 }
0x2a42   :  { %2109 = vrot.lane.b32.xlu0 %v2853_v39, %s2864_s14 }
0x2ab3   :  { %v2083_v57 = vpop.permute.xlu1 %2082 }
0x2ab4   :  { %v2085_v61 = vmul.f32 %v2847_v49, %v2083_v57  ;;  %v2110_v62 = vpop.permute.xlu0 %2109 }
0x2ab5   :  { %v2112_v63 = vmul.f32 %v2849_v51, %v2110_v62 }
0x2ab6   :  { %2118 = vrot.lane.b32.xlu0 %v2085_v61, %s2864_s14 }
0x2ab7   :  { %2114 = vrot.lane.b32.xlu1 %v2112_v63, %s2865_s15 }
0x2b28   :  { %v2119_v0 = vpop.permute.xlu0 %2118 }
0x2b29   :  { %v2115_v2 = vpop.permute.xlu1 %2114 }
0x2b2a   :  { %v2121_v3 = vsel %vm18_vm0, %v2115_v2, %v2119_v0 }
0x2b2b   :  { %2344 = vmatmul.mubr.msk.f32.vlgmr.msra.gmra.mrb[14].mxu1 %vm92_vm1, %v2121_v3 }
0x2bfe   :  { %v2191_v4 = vpop.f32.mrb[14].mxu1 }
0x2bff   :  { %v2196_v5 = vadd.f32 %v3247_v52, %v2191_v4  ;;  %v2193_v6 = vpop.f32.mrb[15].mxu1 }
0x2c01   :  { %2854 = vtanh.f32 %v2196_v5  ;;  %v2345_v10 = vmul.f32 -1.442695, %v2196_v5 }
0x2c03   :  { %2856 = vpow2.f32 %v2345_v10 }
0x2c0b   :  { %v2855_v7 = vpop.eup %2854 }
0x2c0c   :  { %2206 = vrot.lane.b32.xlu1 %v2855_v7, %s2864_s14 }
0x2c0d   :  { %v2857_v11 = vpop.eup %2856 }
0x2c0e   :  { %v2200_v15 = vadd.f32 1.0, %v2857_v11 }
0x2c10   :  { %2858 = vrcp.f32 %v2200_v15 }
0x2c1a   :  { %v2859_v16 = vpop.eup %2858 }
0x2c1b   :  { %v2204_v52 = vmul.f32 %v2859_v16, %v2079_v27 }
0x2c7e   :  { %v2207_v13 = vpop.permute.xlu1 %2206 }
0x2c7f   :  { %v2209_v18 = vmul.f32 %v2859_v16, %v2207_v13 }
0x2c81   :  { %2211 = vrot.lane.b32.xlu0 %v2209_v18, %s2865_s15 }
0x2c85   :  { %2221 = vrot.lane.b32.xlu0 %v3017_v14, %s2865_s15 }
0x2c89   :  { %2233 = vrot.lane.b32.xlu0 %v3225_v43, %s2865_s15 }
0x2c8d   :  { %2224 = vrot.lane.b32.xlu0 %v3069_v34, %s2866_s0 }
0x2c91   :  { %2236 = vrot.lane.b32.xlu0 %v3282_v8, %s2866_s0 }
0x2c95   :  { %2263 = vrot.lane.b32.xlu0 %v2106_v33, %s2866_s0 }
0x2cf3   :  { %v2212_v19 = vpop.permute.xlu0 %2211 }
0x2cf4   :  { %v2214_v45 = vadd.f32 %v2212_v19, %v2204_v52 }
0x2cf6   :  { %2860 = vtanh.f32 %v2214_v45 }
0x2cf7   :  { %v2222_v20 = vpop.permute.xlu0 %2221 }
0x2cf8   :  { %v2245_v25 = vsel %vm18_vm0, %v2222_v20, %v3045_v59 }
0x2cfb   :  { %v2234_v24 = vpop.permute.xlu0 %2233 }
0x2cfc   :  { %v2252_v8 = vsel %vm18_vm0, %v2234_v24, %v3258_v29 }
0x2cff   :  { %v2225_v14 = vpop.permute.xlu0 %2224 }
0x2d00   :  { %v2861_v26 = vpop.eup %2860  ;;  %v2246_v43 = vsel %vm92_vm1, %v2245_v25, %v2225_v14 }
0x2d01   :  { %v2248_v34 = vsel %vm2247_vm2, %v2246_v43, %v3095_v9  ;;  %2217 = vrot.lane.b32.xlu1 %v2861_v26, %s2864_s14 }
0x2d02   :  { %2258 = vst [vmem:[%s3432_s3] sm:$0xff] %v2248_v34 }
0x2d03   :  { %v2237_v30 = vpop.permute.xlu0 %2236 }
0x2d04   :  { %v2253_v17 = vsel %vm92_vm1, %v2252_v8, %v2237_v30 }
0x2d05   :  { %v2254_v59 = vsel %vm2247_vm2, %v2253_v17, %v3308_v58  ;;  %2227 = vrot.lane.b32.xlu1 %v3121_v54, %s2865_s15 }
0x2d06   :  { %2260 = vst [vmem:[%s3432_s3 + $0x10] sm:$0xff] %v2254_v59 }
0x2d07   :  { %v2264_v9 = vpop.permute.xlu0 %2263 }
0x2d08   :  { %2266 = vst.msk [vmem:[#allocation2] sm:$0xff] %vm18_vm0, %v2264_v9 }
0x2d09   :  { %2239 = vrot.lane.b32.xlu1 %v3333_v46, %s2865_s15 }
0x2d0d   :  { %2230 = vrot.lane.b32.xlu1 %v3173_v12, %s2866_s0 }
0x2d11   :  { %2242 = vrot.lane.b32.xlu1 %v2085_v61, %s2866_s0 }
0x2d15   :  { %2268 = vrot.lane.b32.xlu1 %v2214_v45, %s2866_s0 }
0x2d73   :  { %v2218_v29 = vpop.permute.xlu1 %2217 }
0x2d74   :  { %v2220_v31 = vmul.f32 %v2859_v16, %v2218_v29 }
0x2d76   :  { %2273 = vrot.lane.b32.xlu0 %v2220_v31, %s2865_s15 }
0x2d77   :  { %v2228_v58 = vpop.permute.xlu1 %2227 }
0x2d78   :  { %v2249_v32 = vsel %vm18_vm0, %v2228_v58, %v3149_v40 }
0x2d7b   :  { %v2240_v54 = vpop.permute.xlu1 %2239 }
0x2d7c   :  { %v2255_v12 = vsel %vm18_vm0, %v2240_v54, %v3360_v23 }
0x2d7f   :  { %v2231_v36 = vpop.permute.xlu1 %2230 }
0x2d80   :  { %v2250_v37 = vsel %vm92_vm1, %v2249_v32, %v2231_v36 }
0x2d81   :  { %v2251_v38 = vsel %vm2247_vm2, %v2250_v37, %v3199_v60 }
0x2d82   :  { %2259 = vst [vmem:[%s3432_s3 + $0x8] sm:$0xff] %v2251_v38 }
0x2d83   :  { %v2243_v46 = vpop.permute.xlu1 %2242 }
0x2d84   :  { %v2256_v41 = vsel %vm92_vm1, %v2255_v12, %v2243_v46 }
0x2d85   :  { %v2257_v42 = vsel %vm2247_vm2, %v2256_v41, %v2220_v31 }
0x2d86   :  { %2261 = vst [vmem:[%s3432_s3 + $0x18] sm:$0xff] %v2257_v42 }
0x2d87   :  { %v2269_v40 = vpop.permute.xlu1 %2268 }
0x2d88   :  { %2271 = vst.msk [vmem:[#allocation2 + $0x8] sm:$0xff] %vm18_vm0, %v2269_v40 }
0x2de8   :  { %v2274_v60 = vpop.permute.xlu0 %2273 }
0x2de9   :  { %2276 = vst.msk [vmem:[#allocation2 + $0x10] sm:$0xff] %vm18_vm0, %v2274_v60 }

</bundles_post_ra>
